<compile_context>
chip_gen: v7x
topology: tpu7x:2x2x1
jax: 0.10.0
libtpu: 0.0.40
codegen_flags: <defaults>
</compile_context>

<pallas_src>
import functools

import numpy as np
import jax
import jax.numpy as jnp
from jax.experimental import pallas as pl
from jax.experimental.pallas import tpu as pltpu


# ----------------------------------------------------------------------------- kernel
def _fhgc_kernel(mask_ref, w_spa_ref, w_cvt_ref, x_ref, out_ref, agg_ref, wm_ref, *,
                 h, w, chan_expend, d_out, n_agg, roll_shifts, cache_x_casts):
    """One grid step = one clip x one block of channels.

    mask_ref  : (9, 1, hw)             f32  per-tap validity masks (zero-padding emulation)
    w_spa_ref : (9, C_blk, 1)          f32  depthwise dilated 3x3 weights
    w_cvt_ref : (ce*3, C_blk, 1)       f32  depthwise temporal (3,1,1) conv weights
    x_ref     : (1, T_used, C_blk, hw) in dtype   frames of this clip / channel block
    out_ref   : (d_out, C_blk, ce*hw)  out dtype
    agg_ref   : (n_agg, C_blk, hw)     f32  VMEM scratch: spaAgg frames
    wm_ref    : (9, C_blk, hw)         f32  VMEM scratch: weight*mask tap planes
    """
    hw = h * w
    ce = chan_expend

    # Fold the boundary masks into the per-tap depthwise weights, once per step.
    # Kept in VMEM (not vregs) so vreg pressure is bounded for large C_blk.
    for tap in range(9):
        wm_ref[tap] = w_spa_ref[tap] * mask_ref[tap]         # (C_blk,1)*(1,hw) -> (C_blk,hw)

    xf_cache = {}

    def frame_f32(t):
        if not cache_x_casts:
            return x_ref[0, t].astype(jnp.float32)
        v = xf_cache.get(t)
        if v is None:
            v = x_ref[0, t].astype(jnp.float32)
            xf_cache[t] = v
        return v

    # ---- spaAgg: depthwise 3x3, dilation=2, padding=2.  Zero padding is
    # emulated with circular lane rolls (XLU) + precomputed tap masks (any roll
    # wrap implies an out-of-range row/column, which the mask zeroes).
    for t in range(n_agg):
        xt = frame_f32(t)                                    # (C_blk, hw)
        acc = None
        for tap in range(9):
            s = roll_shifts[tap]
            xs = xt if s == 0 else pltpu.roll(xt, shift=s, axis=1)
            term = wm_ref[tap] * xs
            acc = term if acc is None else acc + term
        agg_ref[t] = acc

    # ---- interleaved stream m = 3t + k: k=0 -> agg[t], k=1 -> x[t+1], k=2 -> agg[t+2]
    def frame(m):
        t, k = divmod(m, 3)
        if k == 0:
            return agg_ref[t]
        if k == 1:
            return frame_f32(t + 1)
        return agg_ref[t + 2]

    # ---- convt: depthwise (3,1,1) conv, stride 2 along the interleaved axis.
    for d in range(d_out):
        taps = [frame(2 * d + k) for k in range(3)]          # 3 x (C_blk, hw)
        for e in range(ce):
            acc = (w_cvt_ref[e * 3 + 0] * taps[0]
                   + w_cvt_ref[e * 3 + 1] * taps[1]
                   + w_cvt_ref[e * 3 + 2] * taps[2])
            out_ref[d, :, e * hw:(e + 1) * hw] = acc.astype(out_ref.dtype)


# ----------------------------------------------------------------------------- helpers
def _probe_roll_convention():
    """True if pltpu.roll(x, shift=+1, axis=-1) moves data toward higher lane
    indices (jnp.roll convention).  Probed on the real backend so the tap
    shifts stay correct across jax versions."""
    def k(o_ref):
        lanes = jax.lax.broadcasted_iota(jnp.float32, (8, 128), 1)
        o_ref[...] = pltpu.roll(lanes, shift=1, axis=1)
    try:
        out = pl.pallas_call(
            k, out_shape=jax.ShapeDtypeStruct((8, 128), jnp.float32))()
        return float(jax.device_get(out)[0, 0]) == 127.0
    except Exception:
        return True   # assume jnp.roll semantics if the probe cannot run


_ROLL_MOVES_TO_HIGHER = _probe_roll_convention()   # evaluated eagerly, outside any jit


def _spa_tap_masks(h, w):
    """(9, 1, h*w) f32 validity masks emulating zero padding of the dilated 3x3 conv."""
    hw = h * w
    idx = np.arange(hw)
    ii, jj = idx // w, idx % w
    m = np.zeros((9, 1, hw), np.float32)
    for ki in range(3):
        for kj in range(3):
            di, dj = 2 * (ki - 1), 2 * (kj - 1)
            ok = (ii + di >= 0) & (ii + di < h) & (jj + dj >= 0) & (jj + dj < w)
            m[ki * 3 + kj, 0] = ok.astype(np.float32)
    return jnp.asarray(m)


def _stream_usage(n_segment):
    """convt output depth + which agg / x frames the strided temporal conv consumes."""
    T = n_segment
    d_in = 3 * (T - 2)
    d_out = (d_in - 3) // 2 + 1
    max_agg, max_x = 0, 1
    for d in range(d_out):
        for k in range(3):
            t, kk = divmod(2 * d + k, 3)
            if kk == 0:
                max_agg = max(max_agg, t)
            elif kk == 1:
                max_x = max(max_x, t + 1)
            else:
                max_agg = max(max_agg, t + 2)
    n_agg = max_agg + 1
    t_used = max(n_agg, max_x + 1)         # spaAgg needs x[0..n_agg-1] too
    return d_out, n_agg, t_used


def _vmem_capacity_bytes():
    try:
        info = pltpu.get_tpu_info()
        cap = getattr(info, "vmem_capacity_bytes", None)
        if cap:
            return int(cap)
    except Exception:
        pass
    return 64 * 1024 * 1024                # conservative default (v7x per-TC VMEM)


def _pick_c_block(c, t_used, hw, d_out, ce, itemsize, n_agg, sub, budget_bytes):
    """Largest legal channel block whose per-step working set fits the budget."""
    def blk_bytes(cb):
        x_blk = t_used * cb * hw * itemsize
        out_blk = d_out * cb * ce * hw * itemsize
        agg = n_agg * cb * hw * 4
        wm = 9 * cb * hw * 4
        live = 8 * cb * hw * 4             # head-room for in-flight temporaries
        wgt = 2 * (9 + 3 * ce) * cb * 4
        return 2 * (x_blk + out_blk) + agg + wm + live + wgt + 9 * hw * 4
    cands = sorted({c, *[cb for cb in range(sub, c, sub) if c % cb == 0]})
    fitting = [cb for cb in cands if blk_bytes(cb) <= budget_bytes]
    if fitting:
        return max(fitting)
    return min(cands)                      # degrade gracefully rather than overshoot VMEM


# ----------------------------------------------------------------------------- wrapper
def fhgc_forward(x, w_spa, w_convt, *, n_segment=8, chan_expend=1, c_block=None):
    """Pallas implementation of fhgc.forward.

    x       : (nt, c, h, w), nt = n_clips * n_segment (f32 or bf16; accumulation is f32)
    w_spa   : (c, 1, 3, 3)            spaAgg depthwise dilated-conv weight
    w_convt : (c*ce, 1, 3, 1, 1)      convt depthwise temporal-conv weight
    returns : (n_clips * d_out, c*ce, h, w), dtype of x
    """
    nt, c, h, w = x.shape
    assert nt % n_segment == 0, "nt must be a multiple of n_segment"
    T = n_segment
    assert T >= 3, "n_segment must be >= 3 (otherwise convt output is empty)"
    n = nt // T
    ce = chan_expend
    hw = h * w
    d_out, n_agg, t_used = _stream_usage(T)
    itemsize = jnp.dtype(x.dtype).itemsize
    sub = max(8, 32 // itemsize)           # full-sublane channel multiple for this dtype

    # Generation-aware VMEM budgeting (v7x: 64 MiB/TC; v5e/v6e: 128 MiB).
    vmem_cap = _vmem_capacity_bytes()
    if vmem_cap >= 100 * 1024 * 1024:
        budget_bytes, vmem_limit = 40 * 1024 * 1024, 96 * 1024 * 1024
    else:
        budget_bytes, vmem_limit = 18 * 1024 * 1024, 48 * 1024 * 1024

    if c_block is None:
        c_block = _pick_c_block(c, t_used, hw, d_out, ce, itemsize, n_agg, sub,
                                budget_bytes)
    assert c_block == c or (c_block % sub == 0 and c % c_block == 0), c_block
    n_cb = c // c_block

    # Lane-dense layouts (free row-major reshapes / tiny weight transposes).
    x4 = x.reshape(n, T, c, hw)                                            # (n, T, c, hw)
    w_spa_v = w_spa.reshape(c, 9).T[:, :, None].astype(jnp.float32)        # (9, c, 1)
    w_cvt_v = w_convt.reshape(c, ce * 3).T[:, :, None].astype(jnp.float32) # (ce*3, c, 1)
    tap_masks = _spa_tap_masks(h, w)                                       # (9, 1, hw)

    # Tap shifts on the flattened hw axis, expressed in pltpu.roll's convention.
    shifts = []
    for ki in range(3):
        for kj in range(3):
            s = (2 * (ki - 1) * w + 2 * (kj - 1)) % hw
            shifts.append((hw - s) % hw if _ROLL_MOVES_TO_HIGHER else s)
    roll_shifts = tuple(shifts)

    # Memoise f32 casts of x frames only when they comfortably fit in vregs.
    cache_x_casts = t_used * c_block * hw * 4 <= 64 * 1024

    kernel = functools.partial(
        _fhgc_kernel, h=h, w=w, chan_expend=ce, d_out=d_out, n_agg=n_agg,
        roll_shifts=roll_shifts, cache_x_casts=cache_x_casts)

    out_flat = pl.pallas_call(
        kernel,
        out_shape=jax.ShapeDtypeStruct((n * d_out, c, ce * hw), x.dtype),
        grid_spec=pltpu.PrefetchScalarGridSpec(
            num_scalar_prefetch=0,
            grid=(n, n_cb),                 # both parallel -> feeds both v7x TensorCores
            in_specs=[
                pl.BlockSpec((9, 1, hw), lambda b, cb: (0, 0, 0)),           # masks (resident)
                pl.BlockSpec((9, c_block, 1), lambda b, cb: (0, cb, 0)),      # spaAgg weights
                pl.BlockSpec((ce * 3, c_block, 1), lambda b, cb: (0, cb, 0)), # convt weights
                # Only the t_used frames that are actually consumed are DMA'd.
                pl.BlockSpec((1, t_used, c_block, hw), lambda b, cb: (b, 0, cb, 0)),
            ],
            out_specs=pl.BlockSpec((d_out, c_block, ce * hw),
                                   lambda b, cb: (b, cb, 0)),
            scratch_shapes=[
                pltpu.VMEM((n_agg, c_block, hw), jnp.float32),   # spaAgg frames
                pltpu.VMEM((9, c_block, hw), jnp.float32),       # weight*mask tap planes
            ],
        ),
        compiler_params=pltpu.CompilerParams(
            dimension_semantics=("parallel", "parallel"),
            vmem_limit_bytes=vmem_limit),
    )(tap_masks, w_spa_v, w_cvt_v, x4)

    # Free reshape back to the module's (n*d_out, c*ce, h, w) NCHW output layout.
    return out_flat.reshape(n * d_out, c * ce, h, w)


# ----------------------------------------------------------------------------- reference
def _reference(x, w_spa, w_cvt, n_segment, chan_expend):
    """Pure-JAX reference replicating the PyTorch forward exactly."""
    nt, c, h, w = x.shape
    n = nt // n_segment
    T = n_segment
    agg = jax.lax.conv_general_dilated(
        x, w_spa, window_strides=(1, 1), padding=((2, 2), (2, 2)),
        rhs_dilation=(2, 2), dimension_numbers=('NCHW', 'OIHW', 'NCHW'),
        feature_group_count=c)
    x_r = x.reshape(n, T, 1, c, h, w)
    agg_r = agg.reshape(n, T, 1, c, h, w)
    target = jnp.concatenate([agg_r[:, :-2], x_r[:, 1:-1], agg_r[:, 2:]], axis=2)
    target = target.reshape(n, 3 * (T - 2), c, h, w)
    d_in = 3 * (T - 2)
    d_out = (d_in - 3) // 2 + 1
    wk = w_cvt[:, 0, :, 0, 0]                              # (c*ce, 3)
    outs = []
    for d in range(d_out):
        win = target[:, 2 * d:2 * d + 3]                   # (n, 3, c, h, w)
        win = jnp.repeat(win, chan_expend, axis=2)         # (n, 3, c*ce, h, w)
        outs.append(jnp.einsum('nkchw,ck->nchw', win, wk))
    out = jnp.stack(outs, axis=1)                          # (n, d_out, c*ce, h, w)
    return out.reshape(n * d_out, c * chan_expend, h, w)


if __name__ == "__main__":
    key = jax.random.PRNGKey(0)
    n_segment = 8
    n_clips = 2
    c = 4
    h = w = 16
    chan_expend = 1
    nt = n_clips * n_segment

    kx, kw = jax.random.split(key)
    x = jax.random.normal(kx, (nt, c, h, w), jnp.float32)

    # spaAgg weight: xavier_normal-style deterministic init, shape (c, 1, 3, 3)
    std = (2.0 / (9.0 + 9.0)) ** 0.5
    w_spa = std * jax.random.normal(kw, (c, 1, 3, 3), jnp.float32)

    # convt weight: ME_init=True pattern, shape (c*ce, 1, 3, 1, 1)
    w_convt = jnp.zeros((c * chan_expend, 1, 3, 1, 1), jnp.float32)
    w_convt = w_convt.at[:, 0, 1].set(1.0)
    w_convt = w_convt.at[:, 0, 2].set(-1.0)
    # NOTE: the PyTorch forward also builds an unused `zeros` cuda tensor; it is
    # dead code and intentionally omitted here.

    fwd = jax.jit(functools.partial(fhgc_forward, n_segment=n_segment,
                                    chan_expend=chan_expend))

    # ---- f32 path (matches the PyTorch module's dtype semantics)
    out = jax.block_until_ready(fwd(x, w_spa, w_convt))
    ref = _reference(x, w_spa, w_convt, n_segment, chan_expend)
    assert out.shape == ref.shape, (out.shape, ref.shape)
    err = float(jnp.max(jnp.abs(out - ref)))
    assert jnp.allclose(out, ref, atol=1e-4, rtol=1e-4), err

    # ---- bf16 activation I/O path (f32 accumulation inside the kernel)
    x_bf = x.astype(jnp.bfloat16)
    out_bf = jax.block_until_ready(fwd(x_bf, w_spa, w_convt))
    ref_bf = _reference(x_bf.astype(jnp.float32), w_spa, w_convt,
                        n_segment, chan_expend)
    assert out_bf.dtype == jnp.bfloat16
    assert out_bf.shape == ref_bf.shape
    assert jnp.allclose(out_bf.astype(jnp.float32), ref_bf, atol=1e-1, rtol=1e-2)

    print("KERNEL_OK")
</pallas_src>

<mosaic_0001>
module attributes {stable_mosaic.version = 11 : i64} {
  func.func @_fhgc_kernel(%arg0: i32, %arg1: i32, %arg2: memref<9x1x256xf32, #tpu.memory_space<vmem>>, %arg3: memref<9x4x1xf32, #tpu.memory_space<vmem>>, %arg4: memref<3x4x1xf32, #tpu.memory_space<vmem>>, %arg5: memref<1x7x4x256xf32, #tpu.memory_space<vmem>>, %arg6: memref<8x4x256xf32, #tpu.memory_space<vmem>>, %arg7: memref<7x4x256xf32, #tpu.memory_space<vmem>>, %arg8: memref<9x4x256xf32, #tpu.memory_space<vmem>>) attributes {dimension_semantics = [#tpu.dimension_semantics<parallel>, #tpu.dimension_semantics<parallel>], iteration_bounds = array<i64: 2, 1>, scalar_prefetch = 0 : i64, scratch_operands = 2 : i64, tpu.core_type = #tpu.core_type<tc>, window_params = [{pipeline_mode = #tpu.pipeline_mode<synchronous>, transform_indices = @transform_0, window_bounds = array<i64: 9, 1, 256>}, {transform_indices = @transform_1, window_bounds = array<i64: 9, 4, 1>}, {transform_indices = @transform_2, window_bounds = array<i64: 3, 4, 1>}, {transform_indices = @transform_3, window_bounds = array<i64: 1, 7, 4, 256>}, {transform_indices = @transform_4, window_bounds = array<i64: 8, 4, 256>}]} {
    %c0 = arith.constant 0 : index
    %c0_0 = arith.constant 0 : index
    %c0_1 = arith.constant 0 : index
    %0 = vector.load %arg3[%c0, %c0_0, %c0_1] : memref<9x4x1xf32, #tpu.memory_space<vmem>>, vector<1x4x1xf32>
    %1 = vector.shape_cast %0 : vector<1x4x1xf32> to vector<4x1xf32>
    %c0_2 = arith.constant 0 : index
    %c0_3 = arith.constant 0 : index
    %c0_4 = arith.constant 0 : index
    %2 = vector.load %arg2[%c0_2, %c0_3, %c0_4] : memref<9x1x256xf32, #tpu.memory_space<vmem>>, vector<1x1x256xf32>
    %3 = vector.shape_cast %2 : vector<1x1x256xf32> to vector<1x256xf32>
    %4 = vector.broadcast %1 : vector<4x1xf32> to vector<4x256xf32>
    %5 = vector.broadcast %3 : vector<1x256xf32> to vector<4x256xf32>
    %6 = arith.mulf %4, %5 : vector<4x256xf32>
    %c0_5 = arith.constant 0 : index
    %c0_6 = arith.constant 0 : index
    %c0_7 = arith.constant 0 : index
    %7 = vector.load %arg8[%c0_5, %c0_6, %c0_7] : memref<9x4x256xf32, #tpu.memory_space<vmem>>, vector<1x4x256xf32>
    %8 = vector.shape_cast %7 : vector<1x4x256xf32> to vector<4x256xf32>
    %9 = vector.shape_cast %6 : vector<4x256xf32> to vector<1x4x256xf32>
    tpu.vector_store %arg8[%c0_5, %c0_6, %c0_7], %9 {strides = array<i32>} : memref<9x4x256xf32, #tpu.memory_space<vmem>>, vector<1x4x256xf32>,
    %c1 = arith.constant 1 : index
    %c0_8 = arith.constant 0 : index
    %c0_9 = arith.constant 0 : index
    %10 = vector.load %arg3[%c1, %c0_8, %c0_9] : memref<9x4x1xf32, #tpu.memory_space<vmem>>, vector<1x4x1xf32>
    %11 = vector.shape_cast %10 : vector<1x4x1xf32> to vector<4x1xf32>
    %c1_10 = arith.constant 1 : index
    %c0_11 = arith.constant 0 : index
    %c0_12 = arith.constant 0 : index
    %12 = vector.load %arg2[%c1_10, %c0_11, %c0_12] : memref<9x1x256xf32, #tpu.memory_space<vmem>>, vector<1x1x256xf32>
    %13 = vector.shape_cast %12 : vector<1x1x256xf32> to vector<1x256xf32>
    %14 = vector.broadcast %11 : vector<4x1xf32> to vector<4x256xf32>
    %15 = vector.broadcast %13 : vector<1x256xf32> to vector<4x256xf32>
    %16 = arith.mulf %14, %15 : vector<4x256xf32>
    %c1_13 = arith.constant 1 : index
    %c0_14 = arith.constant 0 : index
    %c0_15 = arith.constant 0 : index
    %17 = vector.load %arg8[%c1_13, %c0_14, %c0_15] : memref<9x4x256xf32, #tpu.memory_space<vmem>>, vector<1x4x256xf32>
    %18 = vector.shape_cast %17 : vector<1x4x256xf32> to vector<4x256xf32>
    %19 = vector.shape_cast %16 : vector<4x256xf32> to vector<1x4x256xf32>
    tpu.vector_store %arg8[%c1_13, %c0_14, %c0_15], %19 {strides = array<i32>} : memref<9x4x256xf32, #tpu.memory_space<vmem>>, vector<1x4x256xf32>,
    %c2 = arith.constant 2 : index
    %c0_16 = arith.constant 0 : index
    %c0_17 = arith.constant 0 : index
    %20 = vector.load %arg3[%c2, %c0_16, %c0_17] : memref<9x4x1xf32, #tpu.memory_space<vmem>>, vector<1x4x1xf32>
    %21 = vector.shape_cast %20 : vector<1x4x1xf32> to vector<4x1xf32>
    %c2_18 = arith.constant 2 : index
    %c0_19 = arith.constant 0 : index
    %c0_20 = arith.constant 0 : index
    %22 = vector.load %arg2[%c2_18, %c0_19, %c0_20] : memref<9x1x256xf32, #tpu.memory_space<vmem>>, vector<1x1x256xf32>
    %23 = vector.shape_cast %22 : vector<1x1x256xf32> to vector<1x256xf32>
    %24 = vector.broadcast %21 : vector<4x1xf32> to vector<4x256xf32>
    %25 = vector.broadcast %23 : vector<1x256xf32> to vector<4x256xf32>
    %26 = arith.mulf %24, %25 : vector<4x256xf32>
    %c2_21 = arith.constant 2 : index
    %c0_22 = arith.constant 0 : index
    %c0_23 = arith.constant 0 : index
    %27 = vector.load %arg8[%c2_21, %c0_22, %c0_23] : memref<9x4x256xf32, #tpu.memory_space<vmem>>, vector<1x4x256xf32>
    %28 = vector.shape_cast %27 : vector<1x4x256xf32> to vector<4x256xf32>
    %29 = vector.shape_cast %26 : vector<4x256xf32> to vector<1x4x256xf32>
    tpu.vector_store %arg8[%c2_21, %c0_22, %c0_23], %29 {strides = array<i32>} : memref<9x4x256xf32, #tpu.memory_space<vmem>>, vector<1x4x256xf32>,
    %c3 = arith.constant 3 : index
    %c0_24 = arith.constant 0 : index
    %c0_25 = arith.constant 0 : index
    %30 = vector.load %arg3[%c3, %c0_24, %c0_25] : memref<9x4x1xf32, #tpu.memory_space<vmem>>, vector<1x4x1xf32>
    %31 = vector.shape_cast %30 : vector<1x4x1xf32> to vector<4x1xf32>
    %c3_26 = arith.constant 3 : index
    %c0_27 = arith.constant 0 : index
    %c0_28 = arith.constant 0 : index
    %32 = vector.load %arg2[%c3_26, %c0_27, %c0_28] : memref<9x1x256xf32, #tpu.memory_space<vmem>>, vector<1x1x256xf32>
    %33 = vector.shape_cast %32 : vector<1x1x256xf32> to vector<1x256xf32>
    %34 = vector.broadcast %31 : vector<4x1xf32> to vector<4x256xf32>
    %35 = vector.broadcast %33 : vector<1x256xf32> to vector<4x256xf32>
    %36 = arith.mulf %34, %35 : vector<4x256xf32>
    %c3_29 = arith.constant 3 : index
    %c0_30 = arith.constant 0 : index
    %c0_31 = arith.constant 0 : index
    %37 = vector.load %arg8[%c3_29, %c0_30, %c0_31] : memref<9x4x256xf32, #tpu.memory_space<vmem>>, vector<1x4x256xf32>
    %38 = vector.shape_cast %37 : vector<1x4x256xf32> to vector<4x256xf32>
    %39 = vector.shape_cast %36 : vector<4x256xf32> to vector<1x4x256xf32>
    tpu.vector_store %arg8[%c3_29, %c0_30, %c0_31], %39 {strides = array<i32>} : memref<9x4x256xf32, #tpu.memory_space<vmem>>, vector<1x4x256xf32>,
    %c4 = arith.constant 4 : index
    %c0_32 = arith.constant 0 : index
    %c0_33 = arith.constant 0 : index
    %40 = vector.load %arg3[%c4, %c0_32, %c0_33] : memref<9x4x1xf32, #tpu.memory_space<vmem>>, vector<1x4x1xf32>
    %41 = vector.shape_cast %40 : vector<1x4x1xf32> to vector<4x1xf32>
    %c4_34 = arith.constant 4 : index
    %c0_35 = arith.constant 0 : index
    %c0_36 = arith.constant 0 : index
    %42 = vector.load %arg2[%c4_34, %c0_35, %c0_36] : memref<9x1x256xf32, #tpu.memory_space<vmem>>, vector<1x1x256xf32>
    %43 = vector.shape_cast %42 : vector<1x1x256xf32> to vector<1x256xf32>
    %44 = vector.broadcast %41 : vector<4x1xf32> to vector<4x256xf32>
    %45 = vector.broadcast %43 : vector<1x256xf32> to vector<4x256xf32>
    %46 = arith.mulf %44, %45 : vector<4x256xf32>
    %c4_37 = arith.constant 4 : index
    %c0_38 = arith.constant 0 : index
    %c0_39 = arith.constant 0 : index
    %47 = vector.load %arg8[%c4_37, %c0_38, %c0_39] : memref<9x4x256xf32, #tpu.memory_space<vmem>>, vector<1x4x256xf32>
    %48 = vector.shape_cast %47 : vector<1x4x256xf32> to vector<4x256xf32>
    %49 = vector.shape_cast %46 : vector<4x256xf32> to vector<1x4x256xf32>
    tpu.vector_store %arg8[%c4_37, %c0_38, %c0_39], %49 {strides = array<i32>} : memref<9x4x256xf32, #tpu.memory_space<vmem>>, vector<1x4x256xf32>,
    %c5 = arith.constant 5 : index
    %c0_40 = arith.constant 0 : index
    %c0_41 = arith.constant 0 : index
    %50 = vector.load %arg3[%c5, %c0_40, %c0_41] : memref<9x4x1xf32, #tpu.memory_space<vmem>>, vector<1x4x1xf32>
    %51 = vector.shape_cast %50 : vector<1x4x1xf32> to vector<4x1xf32>
    %c5_42 = arith.constant 5 : index
    %c0_43 = arith.constant 0 : index
    %c0_44 = arith.constant 0 : index
    %52 = vector.load %arg2[%c5_42, %c0_43, %c0_44] : memref<9x1x256xf32, #tpu.memory_space<vmem>>, vector<1x1x256xf32>
    %53 = vector.shape_cast %52 : vector<1x1x256xf32> to vector<1x256xf32>
    %54 = vector.broadcast %51 : vector<4x1xf32> to vector<4x256xf32>
    %55 = vector.broadcast %53 : vector<1x256xf32> to vector<4x256xf32>
    %56 = arith.mulf %54, %55 : vector<4x256xf32>
    %c5_45 = arith.constant 5 : index
    %c0_46 = arith.constant 0 : index
    %c0_47 = arith.constant 0 : index
    %57 = vector.load %arg8[%c5_45, %c0_46, %c0_47] : memref<9x4x256xf32, #tpu.memory_space<vmem>>, vector<1x4x256xf32>
    %58 = vector.shape_cast %57 : vector<1x4x256xf32> to vector<4x256xf32>
    %59 = vector.shape_cast %56 : vector<4x256xf32> to vector<1x4x256xf32>
    tpu.vector_store %arg8[%c5_45, %c0_46, %c0_47], %59 {strides = array<i32>} : memref<9x4x256xf32, #tpu.memory_space<vmem>>, vector<1x4x256xf32>,
    %c6 = arith.constant 6 : index
    %c0_48 = arith.constant 0 : index
    %c0_49 = arith.constant 0 : index
    %60 = vector.load %arg3[%c6, %c0_48, %c0_49] : memref<9x4x1xf32, #tpu.memory_space<vmem>>, vector<1x4x1xf32>
    %61 = vector.shape_cast %60 : vector<1x4x1xf32> to vector<4x1xf32>
    %c6_50 = arith.constant 6 : index
    %c0_51 = arith.constant 0 : index
    %c0_52 = arith.constant 0 : index
    %62 = vector.load %arg2[%c6_50, %c0_51, %c0_52] : memref<9x1x256xf32, #tpu.memory_space<vmem>>, vector<1x1x256xf32>
    %63 = vector.shape_cast %62 : vector<1x1x256xf32> to vector<1x256xf32>
    %64 = vector.broadcast %61 : vector<4x1xf32> to vector<4x256xf32>
    %65 = vector.broadcast %63 : vector<1x256xf32> to vector<4x256xf32>
    %66 = arith.mulf %64, %65 : vector<4x256xf32>
    %c6_53 = arith.constant 6 : index
    %c0_54 = arith.constant 0 : index
    %c0_55 = arith.constant 0 : index
    %67 = vector.load %arg8[%c6_53, %c0_54, %c0_55] : memref<9x4x256xf32, #tpu.memory_space<vmem>>, vector<1x4x256xf32>
    %68 = vector.shape_cast %67 : vector<1x4x256xf32> to vector<4x256xf32>
    %69 = vector.shape_cast %66 : vector<4x256xf32> to vector<1x4x256xf32>
    tpu.vector_store %arg8[%c6_53, %c0_54, %c0_55], %69 {strides = array<i32>} : memref<9x4x256xf32, #tpu.memory_space<vmem>>, vector<1x4x256xf32>,
    %c7 = arith.constant 7 : index
    %c0_56 = arith.constant 0 : index
    %c0_57 = arith.constant 0 : index
    %70 = vector.load %arg3[%c7, %c0_56, %c0_57] : memref<9x4x1xf32, #tpu.memory_space<vmem>>, vector<1x4x1xf32>
    %71 = vector.shape_cast %70 : vector<1x4x1xf32> to vector<4x1xf32>
    %c7_58 = arith.constant 7 : index
    %c0_59 = arith.constant 0 : index
    %c0_60 = arith.constant 0 : index
    %72 = vector.load %arg2[%c7_58, %c0_59, %c0_60] : memref<9x1x256xf32, #tpu.memory_space<vmem>>, vector<1x1x256xf32>
    %73 = vector.shape_cast %72 : vector<1x1x256xf32> to vector<1x256xf32>
    %74 = vector.broadcast %71 : vector<4x1xf32> to vector<4x256xf32>
    %75 = vector.broadcast %73 : vector<1x256xf32> to vector<4x256xf32>
    %76 = arith.mulf %74, %75 : vector<4x256xf32>
    %c7_61 = arith.constant 7 : index
    %c0_62 = arith.constant 0 : index
    %c0_63 = arith.constant 0 : index
    %77 = vector.load %arg8[%c7_61, %c0_62, %c0_63] : memref<9x4x256xf32, #tpu.memory_space<vmem>>, vector<1x4x256xf32>
    %78 = vector.shape_cast %77 : vector<1x4x256xf32> to vector<4x256xf32>
    %79 = vector.shape_cast %76 : vector<4x256xf32> to vector<1x4x256xf32>
    tpu.vector_store %arg8[%c7_61, %c0_62, %c0_63], %79 {strides = array<i32>} : memref<9x4x256xf32, #tpu.memory_space<vmem>>, vector<1x4x256xf32>,
    %c8 = arith.constant 8 : index
    %c0_64 = arith.constant 0 : index
    %c0_65 = arith.constant 0 : index
    %80 = vector.load %arg3[%c8, %c0_64, %c0_65] : memref<9x4x1xf32, #tpu.memory_space<vmem>>, vector<1x4x1xf32>
    %81 = vector.shape_cast %80 : vector<1x4x1xf32> to vector<4x1xf32>
    %c8_66 = arith.constant 8 : index
    %c0_67 = arith.constant 0 : index
    %c0_68 = arith.constant 0 : index
    %82 = vector.load %arg2[%c8_66, %c0_67, %c0_68] : memref<9x1x256xf32, #tpu.memory_space<vmem>>, vector<1x1x256xf32>
    %83 = vector.shape_cast %82 : vector<1x1x256xf32> to vector<1x256xf32>
    %84 = vector.broadcast %81 : vector<4x1xf32> to vector<4x256xf32>
    %85 = vector.broadcast %83 : vector<1x256xf32> to vector<4x256xf32>
    %86 = arith.mulf %84, %85 : vector<4x256xf32>
    %c8_69 = arith.constant 8 : index
    %c0_70 = arith.constant 0 : index
    %c0_71 = arith.constant 0 : index
    %87 = vector.load %arg8[%c8_69, %c0_70, %c0_71] : memref<9x4x256xf32, #tpu.memory_space<vmem>>, vector<1x4x256xf32>
    %88 = vector.shape_cast %87 : vector<1x4x256xf32> to vector<4x256xf32>
    %89 = vector.shape_cast %86 : vector<4x256xf32> to vector<1x4x256xf32>
    tpu.vector_store %arg8[%c8_69, %c0_70, %c0_71], %89 {strides = array<i32>} : memref<9x4x256xf32, #tpu.memory_space<vmem>>, vector<1x4x256xf32>,
    %c0_72 = arith.constant 0 : index
    %c0_73 = arith.constant 0 : index
    %c0_74 = arith.constant 0 : index
    %c0_75 = arith.constant 0 : index
    %90 = vector.load %arg5[%c0_72, %c0_73, %c0_74, %c0_75] : memref<1x7x4x256xf32, #tpu.memory_space<vmem>>, vector<1x1x4x256xf32>
    %91 = vector.shape_cast %90 : vector<1x1x4x256xf32> to vector<4x256xf32>
    %c34_i32 = arith.constant 34 : i32
    %92 = tpu.dynamic_rotate %91 by %c34_i32 dim 1 : vector<4x256xf32>, i32 -> vector<4x256xf32>
    %c0_76 = arith.constant 0 : index
    %c0_77 = arith.constant 0 : index
    %c0_78 = arith.constant 0 : index
    %93 = vector.load %arg8[%c0_76, %c0_77, %c0_78] : memref<9x4x256xf32, #tpu.memory_space<vmem>>, vector<1x4x256xf32>
    %94 = vector.shape_cast %93 : vector<1x4x256xf32> to vector<4x256xf32>
    %95 = arith.mulf %94, %92 : vector<4x256xf32>
    %c32_i32 = arith.constant 32 : i32
    %96 = tpu.dynamic_rotate %91 by %c32_i32 dim 1 : vector<4x256xf32>, i32 -> vector<4x256xf32>
    %c1_79 = arith.constant 1 : index
    %c0_80 = arith.constant 0 : index
    %c0_81 = arith.constant 0 : index
    %97 = vector.load %arg8[%c1_79, %c0_80, %c0_81] : memref<9x4x256xf32, #tpu.memory_space<vmem>>, vector<1x4x256xf32>
    %98 = vector.shape_cast %97 : vector<1x4x256xf32> to vector<4x256xf32>
    %99 = arith.mulf %98, %96 : vector<4x256xf32>
    %100 = arith.addf %95, %99 : vector<4x256xf32>
    %c30_i32 = arith.constant 30 : i32
    %101 = tpu.dynamic_rotate %91 by %c30_i32 dim 1 : vector<4x256xf32>, i32 -> vector<4x256xf32>
    %c2_82 = arith.constant 2 : index
    %c0_83 = arith.constant 0 : index
    %c0_84 = arith.constant 0 : index
    %102 = vector.load %arg8[%c2_82, %c0_83, %c0_84] : memref<9x4x256xf32, #tpu.memory_space<vmem>>, vector<1x4x256xf32>
    %103 = vector.shape_cast %102 : vector<1x4x256xf32> to vector<4x256xf32>
    %104 = arith.mulf %103, %101 : vector<4x256xf32>
    %105 = arith.addf %100, %104 : vector<4x256xf32>
    %c2_i32 = arith.constant 2 : i32
    %106 = tpu.dynamic_rotate %91 by %c2_i32 dim 1 : vector<4x256xf32>, i32 -> vector<4x256xf32>
    %c3_85 = arith.constant 3 : index
    %c0_86 = arith.constant 0 : index
    %c0_87 = arith.constant 0 : index
    %107 = vector.load %arg8[%c3_85, %c0_86, %c0_87] : memref<9x4x256xf32, #tpu.memory_space<vmem>>, vector<1x4x256xf32>
    %108 = vector.shape_cast %107 : vector<1x4x256xf32> to vector<4x256xf32>
    %109 = arith.mulf %108, %106 : vector<4x256xf32>
    %110 = arith.addf %105, %109 : vector<4x256xf32>
    %c4_88 = arith.constant 4 : index
    %c0_89 = arith.constant 0 : index
    %c0_90 = arith.constant 0 : index
    %111 = vector.load %arg8[%c4_88, %c0_89, %c0_90] : memref<9x4x256xf32, #tpu.memory_space<vmem>>, vector<1x4x256xf32>
    %112 = vector.shape_cast %111 : vector<1x4x256xf32> to vector<4x256xf32>
    %113 = arith.mulf %112, %91 : vector<4x256xf32>
    %114 = arith.addf %110, %113 : vector<4x256xf32>
    %c254_i32 = arith.constant 254 : i32
    %115 = tpu.dynamic_rotate %91 by %c254_i32 dim 1 : vector<4x256xf32>, i32 -> vector<4x256xf32>
    %c5_91 = arith.constant 5 : index
    %c0_92 = arith.constant 0 : index
    %c0_93 = arith.constant 0 : index
    %116 = vector.load %arg8[%c5_91, %c0_92, %c0_93] : memref<9x4x256xf32, #tpu.memory_space<vmem>>, vector<1x4x256xf32>
    %117 = vector.shape_cast %116 : vector<1x4x256xf32> to vector<4x256xf32>
    %118 = arith.mulf %117, %115 : vector<4x256xf32>
    %119 = arith.addf %114, %118 : vector<4x256xf32>
    %c226_i32 = arith.constant 226 : i32
    %120 = tpu.dynamic_rotate %91 by %c226_i32 dim 1 : vector<4x256xf32>, i32 -> vector<4x256xf32>
    %c6_94 = arith.constant 6 : index
    %c0_95 = arith.constant 0 : index
    %c0_96 = arith.constant 0 : index
    %121 = vector.load %arg8[%c6_94, %c0_95, %c0_96] : memref<9x4x256xf32, #tpu.memory_space<vmem>>, vector<1x4x256xf32>
    %122 = vector.shape_cast %121 : vector<1x4x256xf32> to vector<4x256xf32>
    %123 = arith.mulf %122, %120 : vector<4x256xf32>
    %124 = arith.addf %119, %123 : vector<4x256xf32>
    %c224_i32 = arith.constant 224 : i32
    %125 = tpu.dynamic_rotate %91 by %c224_i32 dim 1 : vector<4x256xf32>, i32 -> vector<4x256xf32>
    %c7_97 = arith.constant 7 : index
    %c0_98 = arith.constant 0 : index
    %c0_99 = arith.constant 0 : index
    %126 = vector.load %arg8[%c7_97, %c0_98, %c0_99] : memref<9x4x256xf32, #tpu.memory_space<vmem>>, vector<1x4x256xf32>
    %127 = vector.shape_cast %126 : vector<1x4x256xf32> to vector<4x256xf32>
    %128 = arith.mulf %127, %125 : vector<4x256xf32>
    %129 = arith.addf %124, %128 : vector<4x256xf32>
    %c222_i32 = arith.constant 222 : i32
    %130 = tpu.dynamic_rotate %91 by %c222_i32 dim 1 : vector<4x256xf32>, i32 -> vector<4x256xf32>
    %c8_100 = arith.constant 8 : index
    %c0_101 = arith.constant 0 : index
    %c0_102 = arith.constant 0 : index
    %131 = vector.load %arg8[%c8_100, %c0_101, %c0_102] : memref<9x4x256xf32, #tpu.memory_space<vmem>>, vector<1x4x256xf32>
    %132 = vector.shape_cast %131 : vector<1x4x256xf32> to vector<4x256xf32>
    %133 = arith.mulf %132, %130 : vector<4x256xf32>
    %134 = arith.addf %129, %133 : vector<4x256xf32>
    %c0_103 = arith.constant 0 : index
    %c0_104 = arith.constant 0 : index
    %c0_105 = arith.constant 0 : index
    %135 = vector.load %arg7[%c0_103, %c0_104, %c0_105] : memref<7x4x256xf32, #tpu.memory_space<vmem>>, vector<1x4x256xf32>
    %136 = vector.shape_cast %135 : vector<1x4x256xf32> to vector<4x256xf32>
    %137 = vector.shape_cast %134 : vector<4x256xf32> to vector<1x4x256xf32>
    tpu.vector_store %arg7[%c0_103, %c0_104, %c0_105], %137 {strides = array<i32>} : memref<7x4x256xf32, #tpu.memory_space<vmem>>, vector<1x4x256xf32>,
    %c0_106 = arith.constant 0 : index
    %c1_107 = arith.constant 1 : index
    %c0_108 = arith.constant 0 : index
    %c0_109 = arith.constant 0 : index
    %138 = vector.load %arg5[%c0_106, %c1_107, %c0_108, %c0_109] : memref<1x7x4x256xf32, #tpu.memory_space<vmem>>, vector<1x1x4x256xf32>
    %139 = vector.shape_cast %138 : vector<1x1x4x256xf32> to vector<4x256xf32>
    %c34_i32_110 = arith.constant 34 : i32
    %140 = tpu.dynamic_rotate %139 by %c34_i32_110 dim 1 : vector<4x256xf32>, i32 -> vector<4x256xf32>
    %c0_111 = arith.constant 0 : index
    %c0_112 = arith.constant 0 : index
    %c0_113 = arith.constant 0 : index
    %141 = vector.load %arg8[%c0_111, %c0_112, %c0_113] : memref<9x4x256xf32, #tpu.memory_space<vmem>>, vector<1x4x256xf32>
    %142 = vector.shape_cast %141 : vector<1x4x256xf32> to vector<4x256xf32>
    %143 = arith.mulf %142, %140 : vector<4x256xf32>
    %c32_i32_114 = arith.constant 32 : i32
    %144 = tpu.dynamic_rotate %139 by %c32_i32_114 dim 1 : vector<4x256xf32>, i32 -> vector<4x256xf32>
    %c1_115 = arith.constant 1 : index
    %c0_116 = arith.constant 0 : index
    %c0_117 = arith.constant 0 : index
    %145 = vector.load %arg8[%c1_115, %c0_116, %c0_117] : memref<9x4x256xf32, #tpu.memory_space<vmem>>, vector<1x4x256xf32>
    %146 = vector.shape_cast %145 : vector<1x4x256xf32> to vector<4x256xf32>
    %147 = arith.mulf %146, %144 : vector<4x256xf32>
    %148 = arith.addf %143, %147 : vector<4x256xf32>
    %c30_i32_118 = arith.constant 30 : i32
    %149 = tpu.dynamic_rotate %139 by %c30_i32_118 dim 1 : vector<4x256xf32>, i32 -> vector<4x256xf32>
    %c2_119 = arith.constant 2 : index
    %c0_120 = arith.constant 0 : index
    %c0_121 = arith.constant 0 : index
    %150 = vector.load %arg8[%c2_119, %c0_120, %c0_121] : memref<9x4x256xf32, #tpu.memory_space<vmem>>, vector<1x4x256xf32>
    %151 = vector.shape_cast %150 : vector<1x4x256xf32> to vector<4x256xf32>
    %152 = arith.mulf %151, %149 : vector<4x256xf32>
    %153 = arith.addf %148, %152 : vector<4x256xf32>
    %c2_i32_122 = arith.constant 2 : i32
    %154 = tpu.dynamic_rotate %139 by %c2_i32_122 dim 1 : vector<4x256xf32>, i32 -> vector<4x256xf32>
    %c3_123 = arith.constant 3 : index
    %c0_124 = arith.constant 0 : index
    %c0_125 = arith.constant 0 : index
    %155 = vector.load %arg8[%c3_123, %c0_124, %c0_125] : memref<9x4x256xf32, #tpu.memory_space<vmem>>, vector<1x4x256xf32>
    %156 = vector.shape_cast %155 : vector<1x4x256xf32> to vector<4x256xf32>
    %157 = arith.mulf %156, %154 : vector<4x256xf32>
    %158 = arith.addf %153, %157 : vector<4x256xf32>
    %c4_126 = arith.constant 4 : index
    %c0_127 = arith.constant 0 : index
    %c0_128 = arith.constant 0 : index
    %159 = vector.load %arg8[%c4_126, %c0_127, %c0_128] : memref<9x4x256xf32, #tpu.memory_space<vmem>>, vector<1x4x256xf32>
    %160 = vector.shape_cast %159 : vector<1x4x256xf32> to vector<4x256xf32>
    %161 = arith.mulf %160, %139 : vector<4x256xf32>
    %162 = arith.addf %158, %161 : vector<4x256xf32>
    %c254_i32_129 = arith.constant 254 : i32
    %163 = tpu.dynamic_rotate %139 by %c254_i32_129 dim 1 : vector<4x256xf32>, i32 -> vector<4x256xf32>
    %c5_130 = arith.constant 5 : index
    %c0_131 = arith.constant 0 : index
    %c0_132 = arith.constant 0 : index
    %164 = vector.load %arg8[%c5_130, %c0_131, %c0_132] : memref<9x4x256xf32, #tpu.memory_space<vmem>>, vector<1x4x256xf32>
    %165 = vector.shape_cast %164 : vector<1x4x256xf32> to vector<4x256xf32>
    %166 = arith.mulf %165, %163 : vector<4x256xf32>
    %167 = arith.addf %162, %166 : vector<4x256xf32>
    %c226_i32_133 = arith.constant 226 : i32
    %168 = tpu.dynamic_rotate %139 by %c226_i32_133 dim 1 : vector<4x256xf32>, i32 -> vector<4x256xf32>
    %c6_134 = arith.constant 6 : index
    %c0_135 = arith.constant 0 : index
    %c0_136 = arith.constant 0 : index
    %169 = vector.load %arg8[%c6_134, %c0_135, %c0_136] : memref<9x4x256xf32, #tpu.memory_space<vmem>>, vector<1x4x256xf32>
    %170 = vector.shape_cast %169 : vector<1x4x256xf32> to vector<4x256xf32>
    %171 = arith.mulf %170, %168 : vector<4x256xf32>
    %172 = arith.addf %167, %171 : vector<4x256xf32>
    %c224_i32_137 = arith.constant 224 : i32
    %173 = tpu.dynamic_rotate %139 by %c224_i32_137 dim 1 : vector<4x256xf32>, i32 -> vector<4x256xf32>
    %c7_138 = arith.constant 7 : index
    %c0_139 = arith.constant 0 : index
    %c0_140 = arith.constant 0 : index
    %174 = vector.load %arg8[%c7_138, %c0_139, %c0_140] : memref<9x4x256xf32, #tpu.memory_space<vmem>>, vector<1x4x256xf32>
    %175 = vector.shape_cast %174 : vector<1x4x256xf32> to vector<4x256xf32>
    %176 = arith.mulf %175, %173 : vector<4x256xf32>
    %177 = arith.addf %172, %176 : vector<4x256xf32>
    %c222_i32_141 = arith.constant 222 : i32
    %178 = tpu.dynamic_rotate %139 by %c222_i32_141 dim 1 : vector<4x256xf32>, i32 -> vector<4x256xf32>
    %c8_142 = arith.constant 8 : index
    %c0_143 = arith.constant 0 : index
    %c0_144 = arith.constant 0 : index
    %179 = vector.load %arg8[%c8_142, %c0_143, %c0_144] : memref<9x4x256xf32, #tpu.memory_space<vmem>>, vector<1x4x256xf32>
    %180 = vector.shape_cast %179 : vector<1x4x256xf32> to vector<4x256xf32>
    %181 = arith.mulf %180, %178 : vector<4x256xf32>
    %182 = arith.addf %177, %181 : vector<4x256xf32>
    %c1_145 = arith.constant 1 : index
    %c0_146 = arith.constant 0 : index
    %c0_147 = arith.constant 0 : index
    %183 = vector.load %arg7[%c1_145, %c0_146, %c0_147] : memref<7x4x256xf32, #tpu.memory_space<vmem>>, vector<1x4x256xf32>
    %184 = vector.shape_cast %183 : vector<1x4x256xf32> to vector<4x256xf32>
    %185 = vector.shape_cast %182 : vector<4x256xf32> to vector<1x4x256xf32>
    tpu.vector_store %arg7[%c1_145, %c0_146, %c0_147], %185 {strides = array<i32>} : memref<7x4x256xf32, #tpu.memory_space<vmem>>, vector<1x4x256xf32>,
    %c0_148 = arith.constant 0 : index
    %c2_149 = arith.constant 2 : index
    %c0_150 = arith.constant 0 : index
    %c0_151 = arith.constant 0 : index
    %186 = vector.load %arg5[%c0_148, %c2_149, %c0_150, %c0_151] : memref<1x7x4x256xf32, #tpu.memory_space<vmem>>, vector<1x1x4x256xf32>
    %187 = vector.shape_cast %186 : vector<1x1x4x256xf32> to vector<4x256xf32>
    %c34_i32_152 = arith.constant 34 : i32
    %188 = tpu.dynamic_rotate %187 by %c34_i32_152 dim 1 : vector<4x256xf32>, i32 -> vector<4x256xf32>
    %c0_153 = arith.constant 0 : index
    %c0_154 = arith.constant 0 : index
    %c0_155 = arith.constant 0 : index
    %189 = vector.load %arg8[%c0_153, %c0_154, %c0_155] : memref<9x4x256xf32, #tpu.memory_space<vmem>>, vector<1x4x256xf32>
    %190 = vector.shape_cast %189 : vector<1x4x256xf32> to vector<4x256xf32>
    %191 = arith.mulf %190, %188 : vector<4x256xf32>
    %c32_i32_156 = arith.constant 32 : i32
    %192 = tpu.dynamic_rotate %187 by %c32_i32_156 dim 1 : vector<4x256xf32>, i32 -> vector<4x256xf32>
    %c1_157 = arith.constant 1 : index
    %c0_158 = arith.constant 0 : index
    %c0_159 = arith.constant 0 : index
    %193 = vector.load %arg8[%c1_157, %c0_158, %c0_159] : memref<9x4x256xf32, #tpu.memory_space<vmem>>, vector<1x4x256xf32>
    %194 = vector.shape_cast %193 : vector<1x4x256xf32> to vector<4x256xf32>
    %195 = arith.mulf %194, %192 : vector<4x256xf32>
    %196 = arith.addf %191, %195 : vector<4x256xf32>
    %c30_i32_160 = arith.constant 30 : i32
    %197 = tpu.dynamic_rotate %187 by %c30_i32_160 dim 1 : vector<4x256xf32>, i32 -> vector<4x256xf32>
    %c2_161 = arith.constant 2 : index
    %c0_162 = arith.constant 0 : index
    %c0_163 = arith.constant 0 : index
    %198 = vector.load %arg8[%c2_161, %c0_162, %c0_163] : memref<9x4x256xf32, #tpu.memory_space<vmem>>, vector<1x4x256xf32>
    %199 = vector.shape_cast %198 : vector<1x4x256xf32> to vector<4x256xf32>
    %200 = arith.mulf %199, %197 : vector<4x256xf32>
    %201 = arith.addf %196, %200 : vector<4x256xf32>
    %c2_i32_164 = arith.constant 2 : i32
    %202 = tpu.dynamic_rotate %187 by %c2_i32_164 dim 1 : vector<4x256xf32>, i32 -> vector<4x256xf32>
    %c3_165 = arith.constant 3 : index
    %c0_166 = arith.constant 0 : index
    %c0_167 = arith.constant 0 : index
    %203 = vector.load %arg8[%c3_165, %c0_166, %c0_167] : memref<9x4x256xf32, #tpu.memory_space<vmem>>, vector<1x4x256xf32>
    %204 = vector.shape_cast %203 : vector<1x4x256xf32> to vector<4x256xf32>
    %205 = arith.mulf %204, %202 : vector<4x256xf32>
    %206 = arith.addf %201, %205 : vector<4x256xf32>
    %c4_168 = arith.constant 4 : index
    %c0_169 = arith.constant 0 : index
    %c0_170 = arith.constant 0 : index
    %207 = vector.load %arg8[%c4_168, %c0_169, %c0_170] : memref<9x4x256xf32, #tpu.memory_space<vmem>>, vector<1x4x256xf32>
    %208 = vector.shape_cast %207 : vector<1x4x256xf32> to vector<4x256xf32>
    %209 = arith.mulf %208, %187 : vector<4x256xf32>
    %210 = arith.addf %206, %209 : vector<4x256xf32>
    %c254_i32_171 = arith.constant 254 : i32
    %211 = tpu.dynamic_rotate %187 by %c254_i32_171 dim 1 : vector<4x256xf32>, i32 -> vector<4x256xf32>
    %c5_172 = arith.constant 5 : index
    %c0_173 = arith.constant 0 : index
    %c0_174 = arith.constant 0 : index
    %212 = vector.load %arg8[%c5_172, %c0_173, %c0_174] : memref<9x4x256xf32, #tpu.memory_space<vmem>>, vector<1x4x256xf32>
    %213 = vector.shape_cast %212 : vector<1x4x256xf32> to vector<4x256xf32>
    %214 = arith.mulf %213, %211 : vector<4x256xf32>
    %215 = arith.addf %210, %214 : vector<4x256xf32>
    %c226_i32_175 = arith.constant 226 : i32
    %216 = tpu.dynamic_rotate %187 by %c226_i32_175 dim 1 : vector<4x256xf32>, i32 -> vector<4x256xf32>
    %c6_176 = arith.constant 6 : index
    %c0_177 = arith.constant 0 : index
    %c0_178 = arith.constant 0 : index
    %217 = vector.load %arg8[%c6_176, %c0_177, %c0_178] : memref<9x4x256xf32, #tpu.memory_space<vmem>>, vector<1x4x256xf32>
    %218 = vector.shape_cast %217 : vector<1x4x256xf32> to vector<4x256xf32>
    %219 = arith.mulf %218, %216 : vector<4x256xf32>
    %220 = arith.addf %215, %219 : vector<4x256xf32>
    %c224_i32_179 = arith.constant 224 : i32
    %221 = tpu.dynamic_rotate %187 by %c224_i32_179 dim 1 : vector<4x256xf32>, i32 -> vector<4x256xf32>
    %c7_180 = arith.constant 7 : index
    %c0_181 = arith.constant 0 : index
    %c0_182 = arith.constant 0 : index
    %222 = vector.load %arg8[%c7_180, %c0_181, %c0_182] : memref<9x4x256xf32, #tpu.memory_space<vmem>>, vector<1x4x256xf32>
    %223 = vector.shape_cast %222 : vector<1x4x256xf32> to vector<4x256xf32>
    %224 = arith.mulf %223, %221 : vector<4x256xf32>
    %225 = arith.addf %220, %224 : vector<4x256xf32>
    %c222_i32_183 = arith.constant 222 : i32
    %226 = tpu.dynamic_rotate %187 by %c222_i32_183 dim 1 : vector<4x256xf32>, i32 -> vector<4x256xf32>
    %c8_184 = arith.constant 8 : index
    %c0_185 = arith.constant 0 : index
    %c0_186 = arith.constant 0 : index
    %227 = vector.load %arg8[%c8_184, %c0_185, %c0_186] : memref<9x4x256xf32, #tpu.memory_space<vmem>>, vector<1x4x256xf32>
    %228 = vector.shape_cast %227 : vector<1x4x256xf32> to vector<4x256xf32>
    %229 = arith.mulf %228, %226 : vector<4x256xf32>
    %230 = arith.addf %225, %229 : vector<4x256xf32>
    %c2_187 = arith.constant 2 : index
    %c0_188 = arith.constant 0 : index
    %c0_189 = arith.constant 0 : index
    %231 = vector.load %arg7[%c2_187, %c0_188, %c0_189] : memref<7x4x256xf32, #tpu.memory_space<vmem>>, vector<1x4x256xf32>
    %232 = vector.shape_cast %231 : vector<1x4x256xf32> to vector<4x256xf32>
    %233 = vector.shape_cast %230 : vector<4x256xf32> to vector<1x4x256xf32>
    tpu.vector_store %arg7[%c2_187, %c0_188, %c0_189], %233 {strides = array<i32>} : memref<7x4x256xf32, #tpu.memory_space<vmem>>, vector<1x4x256xf32>,
    %c0_190 = arith.constant 0 : index
    %c3_191 = arith.constant 3 : index
    %c0_192 = arith.constant 0 : index
    %c0_193 = arith.constant 0 : index
    %234 = vector.load %arg5[%c0_190, %c3_191, %c0_192, %c0_193] : memref<1x7x4x256xf32, #tpu.memory_space<vmem>>, vector<1x1x4x256xf32>
    %235 = vector.shape_cast %234 : vector<1x1x4x256xf32> to vector<4x256xf32>
    %c34_i32_194 = arith.constant 34 : i32
    %236 = tpu.dynamic_rotate %235 by %c34_i32_194 dim 1 : vector<4x256xf32>, i32 -> vector<4x256xf32>
    %c0_195 = arith.constant 0 : index
    %c0_196 = arith.constant 0 : index
    %c0_197 = arith.constant 0 : index
    %237 = vector.load %arg8[%c0_195, %c0_196, %c0_197] : memref<9x4x256xf32, #tpu.memory_space<vmem>>, vector<1x4x256xf32>
    %238 = vector.shape_cast %237 : vector<1x4x256xf32> to vector<4x256xf32>
    %239 = arith.mulf %238, %236 : vector<4x256xf32>
    %c32_i32_198 = arith.constant 32 : i32
    %240 = tpu.dynamic_rotate %235 by %c32_i32_198 dim 1 : vector<4x256xf32>, i32 -> vector<4x256xf32>
    %c1_199 = arith.constant 1 : index
    %c0_200 = arith.constant 0 : index
    %c0_201 = arith.constant 0 : index
    %241 = vector.load %arg8[%c1_199, %c0_200, %c0_201] : memref<9x4x256xf32, #tpu.memory_space<vmem>>, vector<1x4x256xf32>
    %242 = vector.shape_cast %241 : vector<1x4x256xf32> to vector<4x256xf32>
    %243 = arith.mulf %242, %240 : vector<4x256xf32>
    %244 = arith.addf %239, %243 : vector<4x256xf32>
    %c30_i32_202 = arith.constant 30 : i32
    %245 = tpu.dynamic_rotate %235 by %c30_i32_202 dim 1 : vector<4x256xf32>, i32 -> vector<4x256xf32>
    %c2_203 = arith.constant 2 : index
    %c0_204 = arith.constant 0 : index
    %c0_205 = arith.constant 0 : index
    %246 = vector.load %arg8[%c2_203, %c0_204, %c0_205] : memref<9x4x256xf32, #tpu.memory_space<vmem>>, vector<1x4x256xf32>
    %247 = vector.shape_cast %246 : vector<1x4x256xf32> to vector<4x256xf32>
    %248 = arith.mulf %247, %245 : vector<4x256xf32>
    %249 = arith.addf %244, %248 : vector<4x256xf32>
    %c2_i32_206 = arith.constant 2 : i32
    %250 = tpu.dynamic_rotate %235 by %c2_i32_206 dim 1 : vector<4x256xf32>, i32 -> vector<4x256xf32>
    %c3_207 = arith.constant 3 : index
    %c0_208 = arith.constant 0 : index
    %c0_209 = arith.constant 0 : index
    %251 = vector.load %arg8[%c3_207, %c0_208, %c0_209] : memref<9x4x256xf32, #tpu.memory_space<vmem>>, vector<1x4x256xf32>
    %252 = vector.shape_cast %251 : vector<1x4x256xf32> to vector<4x256xf32>
    %253 = arith.mulf %252, %250 : vector<4x256xf32>
    %254 = arith.addf %249, %253 : vector<4x256xf32>
    %c4_210 = arith.constant 4 : index
    %c0_211 = arith.constant 0 : index
    %c0_212 = arith.constant 0 : index
    %255 = vector.load %arg8[%c4_210, %c0_211, %c0_212] : memref<9x4x256xf32, #tpu.memory_space<vmem>>, vector<1x4x256xf32>
    %256 = vector.shape_cast %255 : vector<1x4x256xf32> to vector<4x256xf32>
    %257 = arith.mulf %256, %235 : vector<4x256xf32>
    %258 = arith.addf %254, %257 : vector<4x256xf32>
    %c254_i32_213 = arith.constant 254 : i32
    %259 = tpu.dynamic_rotate %235 by %c254_i32_213 dim 1 : vector<4x256xf32>, i32 -> vector<4x256xf32>
    %c5_214 = arith.constant 5 : index
    %c0_215 = arith.constant 0 : index
    %c0_216 = arith.constant 0 : index
    %260 = vector.load %arg8[%c5_214, %c0_215, %c0_216] : memref<9x4x256xf32, #tpu.memory_space<vmem>>, vector<1x4x256xf32>
    %261 = vector.shape_cast %260 : vector<1x4x256xf32> to vector<4x256xf32>
    %262 = arith.mulf %261, %259 : vector<4x256xf32>
    %263 = arith.addf %258, %262 : vector<4x256xf32>
    %c226_i32_217 = arith.constant 226 : i32
    %264 = tpu.dynamic_rotate %235 by %c226_i32_217 dim 1 : vector<4x256xf32>, i32 -> vector<4x256xf32>
    %c6_218 = arith.constant 6 : index
    %c0_219 = arith.constant 0 : index
    %c0_220 = arith.constant 0 : index
    %265 = vector.load %arg8[%c6_218, %c0_219, %c0_220] : memref<9x4x256xf32, #tpu.memory_space<vmem>>, vector<1x4x256xf32>
    %266 = vector.shape_cast %265 : vector<1x4x256xf32> to vector<4x256xf32>
    %267 = arith.mulf %266, %264 : vector<4x256xf32>
    %268 = arith.addf %263, %267 : vector<4x256xf32>
    %c224_i32_221 = arith.constant 224 : i32
    %269 = tpu.dynamic_rotate %235 by %c224_i32_221 dim 1 : vector<4x256xf32>, i32 -> vector<4x256xf32>
    %c7_222 = arith.constant 7 : index
    %c0_223 = arith.constant 0 : index
    %c0_224 = arith.constant 0 : index
    %270 = vector.load %arg8[%c7_222, %c0_223, %c0_224] : memref<9x4x256xf32, #tpu.memory_space<vmem>>, vector<1x4x256xf32>
    %271 = vector.shape_cast %270 : vector<1x4x256xf32> to vector<4x256xf32>
    %272 = arith.mulf %271, %269 : vector<4x256xf32>
    %273 = arith.addf %268, %272 : vector<4x256xf32>
    %c222_i32_225 = arith.constant 222 : i32
    %274 = tpu.dynamic_rotate %235 by %c222_i32_225 dim 1 : vector<4x256xf32>, i32 -> vector<4x256xf32>
    %c8_226 = arith.constant 8 : index
    %c0_227 = arith.constant 0 : index
    %c0_228 = arith.constant 0 : index
    %275 = vector.load %arg8[%c8_226, %c0_227, %c0_228] : memref<9x4x256xf32, #tpu.memory_space<vmem>>, vector<1x4x256xf32>
    %276 = vector.shape_cast %275 : vector<1x4x256xf32> to vector<4x256xf32>
    %277 = arith.mulf %276, %274 : vector<4x256xf32>
    %278 = arith.addf %273, %277 : vector<4x256xf32>
    %c3_229 = arith.constant 3 : index
    %c0_230 = arith.constant 0 : index
    %c0_231 = arith.constant 0 : index
    %279 = vector.load %arg7[%c3_229, %c0_230, %c0_231] : memref<7x4x256xf32, #tpu.memory_space<vmem>>, vector<1x4x256xf32>
    %280 = vector.shape_cast %279 : vector<1x4x256xf32> to vector<4x256xf32>
    %281 = vector.shape_cast %278 : vector<4x256xf32> to vector<1x4x256xf32>
    tpu.vector_store %arg7[%c3_229, %c0_230, %c0_231], %281 {strides = array<i32>} : memref<7x4x256xf32, #tpu.memory_space<vmem>>, vector<1x4x256xf32>,
    %c0_232 = arith.constant 0 : index
    %c4_233 = arith.constant 4 : index
    %c0_234 = arith.constant 0 : index
    %c0_235 = arith.constant 0 : index
    %282 = vector.load %arg5[%c0_232, %c4_233, %c0_234, %c0_235] : memref<1x7x4x256xf32, #tpu.memory_space<vmem>>, vector<1x1x4x256xf32>
    %283 = vector.shape_cast %282 : vector<1x1x4x256xf32> to vector<4x256xf32>
    %c34_i32_236 = arith.constant 34 : i32
    %284 = tpu.dynamic_rotate %283 by %c34_i32_236 dim 1 : vector<4x256xf32>, i32 -> vector<4x256xf32>
    %c0_237 = arith.constant 0 : index
    %c0_238 = arith.constant 0 : index
    %c0_239 = arith.constant 0 : index
    %285 = vector.load %arg8[%c0_237, %c0_238, %c0_239] : memref<9x4x256xf32, #tpu.memory_space<vmem>>, vector<1x4x256xf32>
    %286 = vector.shape_cast %285 : vector<1x4x256xf32> to vector<4x256xf32>
    %287 = arith.mulf %286, %284 : vector<4x256xf32>
    %c32_i32_240 = arith.constant 32 : i32
    %288 = tpu.dynamic_rotate %283 by %c32_i32_240 dim 1 : vector<4x256xf32>, i32 -> vector<4x256xf32>
    %c1_241 = arith.constant 1 : index
    %c0_242 = arith.constant 0 : index
    %c0_243 = arith.constant 0 : index
    %289 = vector.load %arg8[%c1_241, %c0_242, %c0_243] : memref<9x4x256xf32, #tpu.memory_space<vmem>>, vector<1x4x256xf32>
    %290 = vector.shape_cast %289 : vector<1x4x256xf32> to vector<4x256xf32>
    %291 = arith.mulf %290, %288 : vector<4x256xf32>
    %292 = arith.addf %287, %291 : vector<4x256xf32>
    %c30_i32_244 = arith.constant 30 : i32
    %293 = tpu.dynamic_rotate %283 by %c30_i32_244 dim 1 : vector<4x256xf32>, i32 -> vector<4x256xf32>
    %c2_245 = arith.constant 2 : index
    %c0_246 = arith.constant 0 : index
    %c0_247 = arith.constant 0 : index
    %294 = vector.load %arg8[%c2_245, %c0_246, %c0_247] : memref<9x4x256xf32, #tpu.memory_space<vmem>>, vector<1x4x256xf32>
    %295 = vector.shape_cast %294 : vector<1x4x256xf32> to vector<4x256xf32>
    %296 = arith.mulf %295, %293 : vector<4x256xf32>
    %297 = arith.addf %292, %296 : vector<4x256xf32>
    %c2_i32_248 = arith.constant 2 : i32
    %298 = tpu.dynamic_rotate %283 by %c2_i32_248 dim 1 : vector<4x256xf32>, i32 -> vector<4x256xf32>
    %c3_249 = arith.constant 3 : index
    %c0_250 = arith.constant 0 : index
    %c0_251 = arith.constant 0 : index
    %299 = vector.load %arg8[%c3_249, %c0_250, %c0_251] : memref<9x4x256xf32, #tpu.memory_space<vmem>>, vector<1x4x256xf32>
    %300 = vector.shape_cast %299 : vector<1x4x256xf32> to vector<4x256xf32>
    %301 = arith.mulf %300, %298 : vector<4x256xf32>
    %302 = arith.addf %297, %301 : vector<4x256xf32>
    %c4_252 = arith.constant 4 : index
    %c0_253 = arith.constant 0 : index
    %c0_254 = arith.constant 0 : index
    %303 = vector.load %arg8[%c4_252, %c0_253, %c0_254] : memref<9x4x256xf32, #tpu.memory_space<vmem>>, vector<1x4x256xf32>
    %304 = vector.shape_cast %303 : vector<1x4x256xf32> to vector<4x256xf32>
    %305 = arith.mulf %304, %283 : vector<4x256xf32>
    %306 = arith.addf %302, %305 : vector<4x256xf32>
    %c254_i32_255 = arith.constant 254 : i32
    %307 = tpu.dynamic_rotate %283 by %c254_i32_255 dim 1 : vector<4x256xf32>, i32 -> vector<4x256xf32>
    %c5_256 = arith.constant 5 : index
    %c0_257 = arith.constant 0 : index
    %c0_258 = arith.constant 0 : index
    %308 = vector.load %arg8[%c5_256, %c0_257, %c0_258] : memref<9x4x256xf32, #tpu.memory_space<vmem>>, vector<1x4x256xf32>
    %309 = vector.shape_cast %308 : vector<1x4x256xf32> to vector<4x256xf32>
    %310 = arith.mulf %309, %307 : vector<4x256xf32>
    %311 = arith.addf %306, %310 : vector<4x256xf32>
    %c226_i32_259 = arith.constant 226 : i32
    %312 = tpu.dynamic_rotate %283 by %c226_i32_259 dim 1 : vector<4x256xf32>, i32 -> vector<4x256xf32>
    %c6_260 = arith.constant 6 : index
    %c0_261 = arith.constant 0 : index
    %c0_262 = arith.constant 0 : index
    %313 = vector.load %arg8[%c6_260, %c0_261, %c0_262] : memref<9x4x256xf32, #tpu.memory_space<vmem>>, vector<1x4x256xf32>
    %314 = vector.shape_cast %313 : vector<1x4x256xf32> to vector<4x256xf32>
    %315 = arith.mulf %314, %312 : vector<4x256xf32>
    %316 = arith.addf %311, %315 : vector<4x256xf32>
    %c224_i32_263 = arith.constant 224 : i32
    %317 = tpu.dynamic_rotate %283 by %c224_i32_263 dim 1 : vector<4x256xf32>, i32 -> vector<4x256xf32>
    %c7_264 = arith.constant 7 : index
    %c0_265 = arith.constant 0 : index
    %c0_266 = arith.constant 0 : index
    %318 = vector.load %arg8[%c7_264, %c0_265, %c0_266] : memref<9x4x256xf32, #tpu.memory_space<vmem>>, vector<1x4x256xf32>
    %319 = vector.shape_cast %318 : vector<1x4x256xf32> to vector<4x256xf32>
    %320 = arith.mulf %319, %317 : vector<4x256xf32>
    %321 = arith.addf %316, %320 : vector<4x256xf32>
    %c222_i32_267 = arith.constant 222 : i32
    %322 = tpu.dynamic_rotate %283 by %c222_i32_267 dim 1 : vector<4x256xf32>, i32 -> vector<4x256xf32>
    %c8_268 = arith.constant 8 : index
    %c0_269 = arith.constant 0 : index
    %c0_270 = arith.constant 0 : index
    %323 = vector.load %arg8[%c8_268, %c0_269, %c0_270] : memref<9x4x256xf32, #tpu.memory_space<vmem>>, vector<1x4x256xf32>
    %324 = vector.shape_cast %323 : vector<1x4x256xf32> to vector<4x256xf32>
    %325 = arith.mulf %324, %322 : vector<4x256xf32>
    %326 = arith.addf %321, %325 : vector<4x256xf32>
    %c4_271 = arith.constant 4 : index
    %c0_272 = arith.constant 0 : index
    %c0_273 = arith.constant 0 : index
    %327 = vector.load %arg7[%c4_271, %c0_272, %c0_273] : memref<7x4x256xf32, #tpu.memory_space<vmem>>, vector<1x4x256xf32>
    %328 = vector.shape_cast %327 : vector<1x4x256xf32> to vector<4x256xf32>
    %329 = vector.shape_cast %326 : vector<4x256xf32> to vector<1x4x256xf32>
    tpu.vector_store %arg7[%c4_271, %c0_272, %c0_273], %329 {strides = array<i32>} : memref<7x4x256xf32, #tpu.memory_space<vmem>>, vector<1x4x256xf32>,
    %c0_274 = arith.constant 0 : index
    %c5_275 = arith.constant 5 : index
    %c0_276 = arith.constant 0 : index
    %c0_277 = arith.constant 0 : index
    %330 = vector.load %arg5[%c0_274, %c5_275, %c0_276, %c0_277] : memref<1x7x4x256xf32, #tpu.memory_space<vmem>>, vector<1x1x4x256xf32>
    %331 = vector.shape_cast %330 : vector<1x1x4x256xf32> to vector<4x256xf32>
    %c34_i32_278 = arith.constant 34 : i32
    %332 = tpu.dynamic_rotate %331 by %c34_i32_278 dim 1 : vector<4x256xf32>, i32 -> vector<4x256xf32>
    %c0_279 = arith.constant 0 : index
    %c0_280 = arith.constant 0 : index
    %c0_281 = arith.constant 0 : index
    %333 = vector.load %arg8[%c0_279, %c0_280, %c0_281] : memref<9x4x256xf32, #tpu.memory_space<vmem>>, vector<1x4x256xf32>
    %334 = vector.shape_cast %333 : vector<1x4x256xf32> to vector<4x256xf32>
    %335 = arith.mulf %334, %332 : vector<4x256xf32>
    %c32_i32_282 = arith.constant 32 : i32
    %336 = tpu.dynamic_rotate %331 by %c32_i32_282 dim 1 : vector<4x256xf32>, i32 -> vector<4x256xf32>
    %c1_283 = arith.constant 1 : index
    %c0_284 = arith.constant 0 : index
    %c0_285 = arith.constant 0 : index
    %337 = vector.load %arg8[%c1_283, %c0_284, %c0_285] : memref<9x4x256xf32, #tpu.memory_space<vmem>>, vector<1x4x256xf32>
    %338 = vector.shape_cast %337 : vector<1x4x256xf32> to vector<4x256xf32>
    %339 = arith.mulf %338, %336 : vector<4x256xf32>
    %340 = arith.addf %335, %339 : vector<4x256xf32>
    %c30_i32_286 = arith.constant 30 : i32
    %341 = tpu.dynamic_rotate %331 by %c30_i32_286 dim 1 : vector<4x256xf32>, i32 -> vector<4x256xf32>
    %c2_287 = arith.constant 2 : index
    %c0_288 = arith.constant 0 : index
    %c0_289 = arith.constant 0 : index
    %342 = vector.load %arg8[%c2_287, %c0_288, %c0_289] : memref<9x4x256xf32, #tpu.memory_space<vmem>>, vector<1x4x256xf32>
    %343 = vector.shape_cast %342 : vector<1x4x256xf32> to vector<4x256xf32>
    %344 = arith.mulf %343, %341 : vector<4x256xf32>
    %345 = arith.addf %340, %344 : vector<4x256xf32>
    %c2_i32_290 = arith.constant 2 : i32
    %346 = tpu.dynamic_rotate %331 by %c2_i32_290 dim 1 : vector<4x256xf32>, i32 -> vector<4x256xf32>
    %c3_291 = arith.constant 3 : index
    %c0_292 = arith.constant 0 : index
    %c0_293 = arith.constant 0 : index
    %347 = vector.load %arg8[%c3_291, %c0_292, %c0_293] : memref<9x4x256xf32, #tpu.memory_space<vmem>>, vector<1x4x256xf32>
    %348 = vector.shape_cast %347 : vector<1x4x256xf32> to vector<4x256xf32>
    %349 = arith.mulf %348, %346 : vector<4x256xf32>
    %350 = arith.addf %345, %349 : vector<4x256xf32>
    %c4_294 = arith.constant 4 : index
    %c0_295 = arith.constant 0 : index
    %c0_296 = arith.constant 0 : index
    %351 = vector.load %arg8[%c4_294, %c0_295, %c0_296] : memref<9x4x256xf32, #tpu.memory_space<vmem>>, vector<1x4x256xf32>
    %352 = vector.shape_cast %351 : vector<1x4x256xf32> to vector<4x256xf32>
    %353 = arith.mulf %352, %331 : vector<4x256xf32>
    %354 = arith.addf %350, %353 : vector<4x256xf32>
    %c254_i32_297 = arith.constant 254 : i32
    %355 = tpu.dynamic_rotate %331 by %c254_i32_297 dim 1 : vector<4x256xf32>, i32 -> vector<4x256xf32>
    %c5_298 = arith.constant 5 : index
    %c0_299 = arith.constant 0 : index
    %c0_300 = arith.constant 0 : index
    %356 = vector.load %arg8[%c5_298, %c0_299, %c0_300] : memref<9x4x256xf32, #tpu.memory_space<vmem>>, vector<1x4x256xf32>
    %357 = vector.shape_cast %356 : vector<1x4x256xf32> to vector<4x256xf32>
    %358 = arith.mulf %357, %355 : vector<4x256xf32>
    %359 = arith.addf %354, %358 : vector<4x256xf32>
    %c226_i32_301 = arith.constant 226 : i32
    %360 = tpu.dynamic_rotate %331 by %c226_i32_301 dim 1 : vector<4x256xf32>, i32 -> vector<4x256xf32>
    %c6_302 = arith.constant 6 : index
    %c0_303 = arith.constant 0 : index
    %c0_304 = arith.constant 0 : index
    %361 = vector.load %arg8[%c6_302, %c0_303, %c0_304] : memref<9x4x256xf32, #tpu.memory_space<vmem>>, vector<1x4x256xf32>
    %362 = vector.shape_cast %361 : vector<1x4x256xf32> to vector<4x256xf32>
    %363 = arith.mulf %362, %360 : vector<4x256xf32>
    %364 = arith.addf %359, %363 : vector<4x256xf32>
    %c224_i32_305 = arith.constant 224 : i32
    %365 = tpu.dynamic_rotate %331 by %c224_i32_305 dim 1 : vector<4x256xf32>, i32 -> vector<4x256xf32>
    %c7_306 = arith.constant 7 : index
    %c0_307 = arith.constant 0 : index
    %c0_308 = arith.constant 0 : index
    %366 = vector.load %arg8[%c7_306, %c0_307, %c0_308] : memref<9x4x256xf32, #tpu.memory_space<vmem>>, vector<1x4x256xf32>
    %367 = vector.shape_cast %366 : vector<1x4x256xf32> to vector<4x256xf32>
    %368 = arith.mulf %367, %365 : vector<4x256xf32>
    %369 = arith.addf %364, %368 : vector<4x256xf32>
    %c222_i32_309 = arith.constant 222 : i32
    %370 = tpu.dynamic_rotate %331 by %c222_i32_309 dim 1 : vector<4x256xf32>, i32 -> vector<4x256xf32>
    %c8_310 = arith.constant 8 : index
    %c0_311 = arith.constant 0 : index
    %c0_312 = arith.constant 0 : index
    %371 = vector.load %arg8[%c8_310, %c0_311, %c0_312] : memref<9x4x256xf32, #tpu.memory_space<vmem>>, vector<1x4x256xf32>
    %372 = vector.shape_cast %371 : vector<1x4x256xf32> to vector<4x256xf32>
    %373 = arith.mulf %372, %370 : vector<4x256xf32>
    %374 = arith.addf %369, %373 : vector<4x256xf32>
    %c5_313 = arith.constant 5 : index
    %c0_314 = arith.constant 0 : index
    %c0_315 = arith.constant 0 : index
    %375 = vector.load %arg7[%c5_313, %c0_314, %c0_315] : memref<7x4x256xf32, #tpu.memory_space<vmem>>, vector<1x4x256xf32>
    %376 = vector.shape_cast %375 : vector<1x4x256xf32> to vector<4x256xf32>
    %377 = vector.shape_cast %374 : vector<4x256xf32> to vector<1x4x256xf32>
    tpu.vector_store %arg7[%c5_313, %c0_314, %c0_315], %377 {strides = array<i32>} : memref<7x4x256xf32, #tpu.memory_space<vmem>>, vector<1x4x256xf32>,
    %c0_316 = arith.constant 0 : index
    %c6_317 = arith.constant 6 : index
    %c0_318 = arith.constant 0 : index
    %c0_319 = arith.constant 0 : index
    %378 = vector.load %arg5[%c0_316, %c6_317, %c0_318, %c0_319] : memref<1x7x4x256xf32, #tpu.memory_space<vmem>>, vector<1x1x4x256xf32>
    %379 = vector.shape_cast %378 : vector<1x1x4x256xf32> to vector<4x256xf32>
    %c34_i32_320 = arith.constant 34 : i32
    %380 = tpu.dynamic_rotate %379 by %c34_i32_320 dim 1 : vector<4x256xf32>, i32 -> vector<4x256xf32>
    %c0_321 = arith.constant 0 : index
    %c0_322 = arith.constant 0 : index
    %c0_323 = arith.constant 0 : index
    %381 = vector.load %arg8[%c0_321, %c0_322, %c0_323] : memref<9x4x256xf32, #tpu.memory_space<vmem>>, vector<1x4x256xf32>
    %382 = vector.shape_cast %381 : vector<1x4x256xf32> to vector<4x256xf32>
    %383 = arith.mulf %382, %380 : vector<4x256xf32>
    %c32_i32_324 = arith.constant 32 : i32
    %384 = tpu.dynamic_rotate %379 by %c32_i32_324 dim 1 : vector<4x256xf32>, i32 -> vector<4x256xf32>
    %c1_325 = arith.constant 1 : index
    %c0_326 = arith.constant 0 : index
    %c0_327 = arith.constant 0 : index
    %385 = vector.load %arg8[%c1_325, %c0_326, %c0_327] : memref<9x4x256xf32, #tpu.memory_space<vmem>>, vector<1x4x256xf32>
    %386 = vector.shape_cast %385 : vector<1x4x256xf32> to vector<4x256xf32>
    %387 = arith.mulf %386, %384 : vector<4x256xf32>
    %388 = arith.addf %383, %387 : vector<4x256xf32>
    %c30_i32_328 = arith.constant 30 : i32
    %389 = tpu.dynamic_rotate %379 by %c30_i32_328 dim 1 : vector<4x256xf32>, i32 -> vector<4x256xf32>
    %c2_329 = arith.constant 2 : index
    %c0_330 = arith.constant 0 : index
    %c0_331 = arith.constant 0 : index
    %390 = vector.load %arg8[%c2_329, %c0_330, %c0_331] : memref<9x4x256xf32, #tpu.memory_space<vmem>>, vector<1x4x256xf32>
    %391 = vector.shape_cast %390 : vector<1x4x256xf32> to vector<4x256xf32>
    %392 = arith.mulf %391, %389 : vector<4x256xf32>
    %393 = arith.addf %388, %392 : vector<4x256xf32>
    %c2_i32_332 = arith.constant 2 : i32
    %394 = tpu.dynamic_rotate %379 by %c2_i32_332 dim 1 : vector<4x256xf32>, i32 -> vector<4x256xf32>
    %c3_333 = arith.constant 3 : index
    %c0_334 = arith.constant 0 : index
    %c0_335 = arith.constant 0 : index
    %395 = vector.load %arg8[%c3_333, %c0_334, %c0_335] : memref<9x4x256xf32, #tpu.memory_space<vmem>>, vector<1x4x256xf32>
    %396 = vector.shape_cast %395 : vector<1x4x256xf32> to vector<4x256xf32>
    %397 = arith.mulf %396, %394 : vector<4x256xf32>
    %398 = arith.addf %393, %397 : vector<4x256xf32>
    %c4_336 = arith.constant 4 : index
    %c0_337 = arith.constant 0 : index
    %c0_338 = arith.constant 0 : index
    %399 = vector.load %arg8[%c4_336, %c0_337, %c0_338] : memref<9x4x256xf32, #tpu.memory_space<vmem>>, vector<1x4x256xf32>
    %400 = vector.shape_cast %399 : vector<1x4x256xf32> to vector<4x256xf32>
    %401 = arith.mulf %400, %379 : vector<4x256xf32>
    %402 = arith.addf %398, %401 : vector<4x256xf32>
    %c254_i32_339 = arith.constant 254 : i32
    %403 = tpu.dynamic_rotate %379 by %c254_i32_339 dim 1 : vector<4x256xf32>, i32 -> vector<4x256xf32>
    %c5_340 = arith.constant 5 : index
    %c0_341 = arith.constant 0 : index
    %c0_342 = arith.constant 0 : index
    %404 = vector.load %arg8[%c5_340, %c0_341, %c0_342] : memref<9x4x256xf32, #tpu.memory_space<vmem>>, vector<1x4x256xf32>
    %405 = vector.shape_cast %404 : vector<1x4x256xf32> to vector<4x256xf32>
    %406 = arith.mulf %405, %403 : vector<4x256xf32>
    %407 = arith.addf %402, %406 : vector<4x256xf32>
    %c226_i32_343 = arith.constant 226 : i32
    %408 = tpu.dynamic_rotate %379 by %c226_i32_343 dim 1 : vector<4x256xf32>, i32 -> vector<4x256xf32>
    %c6_344 = arith.constant 6 : index
    %c0_345 = arith.constant 0 : index
    %c0_346 = arith.constant 0 : index
    %409 = vector.load %arg8[%c6_344, %c0_345, %c0_346] : memref<9x4x256xf32, #tpu.memory_space<vmem>>, vector<1x4x256xf32>
    %410 = vector.shape_cast %409 : vector<1x4x256xf32> to vector<4x256xf32>
    %411 = arith.mulf %410, %408 : vector<4x256xf32>
    %412 = arith.addf %407, %411 : vector<4x256xf32>
    %c224_i32_347 = arith.constant 224 : i32
    %413 = tpu.dynamic_rotate %379 by %c224_i32_347 dim 1 : vector<4x256xf32>, i32 -> vector<4x256xf32>
    %c7_348 = arith.constant 7 : index
    %c0_349 = arith.constant 0 : index
    %c0_350 = arith.constant 0 : index
    %414 = vector.load %arg8[%c7_348, %c0_349, %c0_350] : memref<9x4x256xf32, #tpu.memory_space<vmem>>, vector<1x4x256xf32>
    %415 = vector.shape_cast %414 : vector<1x4x256xf32> to vector<4x256xf32>
    %416 = arith.mulf %415, %413 : vector<4x256xf32>
    %417 = arith.addf %412, %416 : vector<4x256xf32>
    %c222_i32_351 = arith.constant 222 : i32
    %418 = tpu.dynamic_rotate %379 by %c222_i32_351 dim 1 : vector<4x256xf32>, i32 -> vector<4x256xf32>
    %c8_352 = arith.constant 8 : index
    %c0_353 = arith.constant 0 : index
    %c0_354 = arith.constant 0 : index
    %419 = vector.load %arg8[%c8_352, %c0_353, %c0_354] : memref<9x4x256xf32, #tpu.memory_space<vmem>>, vector<1x4x256xf32>
    %420 = vector.shape_cast %419 : vector<1x4x256xf32> to vector<4x256xf32>
    %421 = arith.mulf %420, %418 : vector<4x256xf32>
    %422 = arith.addf %417, %421 : vector<4x256xf32>
    %c6_355 = arith.constant 6 : index
    %c0_356 = arith.constant 0 : index
    %c0_357 = arith.constant 0 : index
    %423 = vector.load %arg7[%c6_355, %c0_356, %c0_357] : memref<7x4x256xf32, #tpu.memory_space<vmem>>, vector<1x4x256xf32>
    %424 = vector.shape_cast %423 : vector<1x4x256xf32> to vector<4x256xf32>
    %425 = vector.shape_cast %422 : vector<4x256xf32> to vector<1x4x256xf32>
    tpu.vector_store %arg7[%c6_355, %c0_356, %c0_357], %425 {strides = array<i32>} : memref<7x4x256xf32, #tpu.memory_space<vmem>>, vector<1x4x256xf32>,
    %c0_358 = arith.constant 0 : index
    %c0_359 = arith.constant 0 : index
    %c0_360 = arith.constant 0 : index
    %426 = vector.load %arg7[%c0_358, %c0_359, %c0_360] : memref<7x4x256xf32, #tpu.memory_space<vmem>>, vector<1x4x256xf32>
    %427 = vector.shape_cast %426 : vector<1x4x256xf32> to vector<4x256xf32>
    %c2_361 = arith.constant 2 : index
    %c0_362 = arith.constant 0 : index
    %c0_363 = arith.constant 0 : index
    %428 = vector.load %arg7[%c2_361, %c0_362, %c0_363] : memref<7x4x256xf32, #tpu.memory_space<vmem>>, vector<1x4x256xf32>
    %429 = vector.shape_cast %428 : vector<1x4x256xf32> to vector<4x256xf32>
    %c0_364 = arith.constant 0 : index
    %c0_365 = arith.constant 0 : index
    %c0_366 = arith.constant 0 : index
    %430 = vector.load %arg4[%c0_364, %c0_365, %c0_366] : memref<3x4x1xf32, #tpu.memory_space<vmem>>, vector<1x4x1xf32>
    %431 = vector.shape_cast %430 : vector<1x4x1xf32> to vector<4x1xf32>
    %432 = vector.broadcast %431 : vector<4x1xf32> to vector<4x256xf32>
    %433 = arith.mulf %432, %427 : vector<4x256xf32>
    %c1_367 = arith.constant 1 : index
    %c0_368 = arith.constant 0 : index
    %c0_369 = arith.constant 0 : index
    %434 = vector.load %arg4[%c1_367, %c0_368, %c0_369] : memref<3x4x1xf32, #tpu.memory_space<vmem>>, vector<1x4x1xf32>
    %435 = vector.shape_cast %434 : vector<1x4x1xf32> to vector<4x1xf32>
    %436 = vector.broadcast %435 : vector<4x1xf32> to vector<4x256xf32>
    %437 = arith.mulf %436, %139 : vector<4x256xf32>
    %438 = arith.addf %433, %437 : vector<4x256xf32>
    %c2_370 = arith.constant 2 : index
    %c0_371 = arith.constant 0 : index
    %c0_372 = arith.constant 0 : index
    %439 = vector.load %arg4[%c2_370, %c0_371, %c0_372] : memref<3x4x1xf32, #tpu.memory_space<vmem>>, vector<1x4x1xf32>
    %440 = vector.shape_cast %439 : vector<1x4x1xf32> to vector<4x1xf32>
    %441 = vector.broadcast %440 : vector<4x1xf32> to vector<4x256xf32>
    %442 = arith.mulf %441, %429 : vector<4x256xf32>
    %443 = arith.addf %438, %442 : vector<4x256xf32>
    %c0_373 = arith.constant 0 : index
    %c0_374 = arith.constant 0 : index
    %c0_375 = arith.constant 0 : index
    %444 = vector.load %arg6[%c0_373, %c0_374, %c0_375] : memref<8x4x256xf32, #tpu.memory_space<vmem>>, vector<1x4x256xf32>
    %445 = vector.shape_cast %444 : vector<1x4x256xf32> to vector<4x256xf32>
    %446 = vector.shape_cast %443 : vector<4x256xf32> to vector<1x4x256xf32>
    tpu.vector_store %arg6[%c0_373, %c0_374, %c0_375], %446 {strides = array<i32>} : memref<8x4x256xf32, #tpu.memory_space<vmem>>, vector<1x4x256xf32>,
    %c2_376 = arith.constant 2 : index
    %c0_377 = arith.constant 0 : index
    %c0_378 = arith.constant 0 : index
    %447 = vector.load %arg7[%c2_376, %c0_377, %c0_378] : memref<7x4x256xf32, #tpu.memory_space<vmem>>, vector<1x4x256xf32>
    %448 = vector.shape_cast %447 : vector<1x4x256xf32> to vector<4x256xf32>
    %c1_379 = arith.constant 1 : index
    %c0_380 = arith.constant 0 : index
    %c0_381 = arith.constant 0 : index
    %449 = vector.load %arg7[%c1_379, %c0_380, %c0_381] : memref<7x4x256xf32, #tpu.memory_space<vmem>>, vector<1x4x256xf32>
    %450 = vector.shape_cast %449 : vector<1x4x256xf32> to vector<4x256xf32>
    %c0_382 = arith.constant 0 : index
    %c0_383 = arith.constant 0 : index
    %c0_384 = arith.constant 0 : index
    %451 = vector.load %arg4[%c0_382, %c0_383, %c0_384] : memref<3x4x1xf32, #tpu.memory_space<vmem>>, vector<1x4x1xf32>
    %452 = vector.shape_cast %451 : vector<1x4x1xf32> to vector<4x1xf32>
    %453 = vector.broadcast %452 : vector<4x1xf32> to vector<4x256xf32>
    %454 = arith.mulf %453, %448 : vector<4x256xf32>
    %c1_385 = arith.constant 1 : index
    %c0_386 = arith.constant 0 : index
    %c0_387 = arith.constant 0 : index
    %455 = vector.load %arg4[%c1_385, %c0_386, %c0_387] : memref<3x4x1xf32, #tpu.memory_space<vmem>>, vector<1x4x1xf32>
    %456 = vector.shape_cast %455 : vector<1x4x1xf32> to vector<4x1xf32>
    %457 = vector.broadcast %456 : vector<4x1xf32> to vector<4x256xf32>
    %458 = arith.mulf %457, %450 : vector<4x256xf32>
    %459 = arith.addf %454, %458 : vector<4x256xf32>
    %c2_388 = arith.constant 2 : index
    %c0_389 = arith.constant 0 : index
    %c0_390 = arith.constant 0 : index
    %460 = vector.load %arg4[%c2_388, %c0_389, %c0_390] : memref<3x4x1xf32, #tpu.memory_space<vmem>>, vector<1x4x1xf32>
    %461 = vector.shape_cast %460 : vector<1x4x1xf32> to vector<4x1xf32>
    %462 = vector.broadcast %461 : vector<4x1xf32> to vector<4x256xf32>
    %463 = arith.mulf %462, %187 : vector<4x256xf32>
    %464 = arith.addf %459, %463 : vector<4x256xf32>
    %c1_391 = arith.constant 1 : index
    %c0_392 = arith.constant 0 : index
    %c0_393 = arith.constant 0 : index
    %465 = vector.load %arg6[%c1_391, %c0_392, %c0_393] : memref<8x4x256xf32, #tpu.memory_space<vmem>>, vector<1x4x256xf32>
    %466 = vector.shape_cast %465 : vector<1x4x256xf32> to vector<4x256xf32>
    %467 = vector.shape_cast %464 : vector<4x256xf32> to vector<1x4x256xf32>
    tpu.vector_store %arg6[%c1_391, %c0_392, %c0_393], %467 {strides = array<i32>} : memref<8x4x256xf32, #tpu.memory_space<vmem>>, vector<1x4x256xf32>,
    %c3_394 = arith.constant 3 : index
    %c0_395 = arith.constant 0 : index
    %c0_396 = arith.constant 0 : index
    %468 = vector.load %arg7[%c3_394, %c0_395, %c0_396] : memref<7x4x256xf32, #tpu.memory_space<vmem>>, vector<1x4x256xf32>
    %469 = vector.shape_cast %468 : vector<1x4x256xf32> to vector<4x256xf32>
    %c2_397 = arith.constant 2 : index
    %c0_398 = arith.constant 0 : index
    %c0_399 = arith.constant 0 : index
    %470 = vector.load %arg7[%c2_397, %c0_398, %c0_399] : memref<7x4x256xf32, #tpu.memory_space<vmem>>, vector<1x4x256xf32>
    %471 = vector.shape_cast %470 : vector<1x4x256xf32> to vector<4x256xf32>
    %c0_400 = arith.constant 0 : index
    %c0_401 = arith.constant 0 : index
    %c0_402 = arith.constant 0 : index
    %472 = vector.load %arg4[%c0_400, %c0_401, %c0_402] : memref<3x4x1xf32, #tpu.memory_space<vmem>>, vector<1x4x1xf32>
    %473 = vector.shape_cast %472 : vector<1x4x1xf32> to vector<4x1xf32>
    %474 = vector.broadcast %473 : vector<4x1xf32> to vector<4x256xf32>
    %475 = arith.mulf %474, %187 : vector<4x256xf32>
    %c1_403 = arith.constant 1 : index
    %c0_404 = arith.constant 0 : index
    %c0_405 = arith.constant 0 : index
    %476 = vector.load %arg4[%c1_403, %c0_404, %c0_405] : memref<3x4x1xf32, #tpu.memory_space<vmem>>, vector<1x4x1xf32>
    %477 = vector.shape_cast %476 : vector<1x4x1xf32> to vector<4x1xf32>
    %478 = vector.broadcast %477 : vector<4x1xf32> to vector<4x256xf32>
    %479 = arith.mulf %478, %469 : vector<4x256xf32>
    %480 = arith.addf %475, %479 : vector<4x256xf32>
    %c2_406 = arith.constant 2 : index
    %c0_407 = arith.constant 0 : index
    %c0_408 = arith.constant 0 : index
    %481 = vector.load %arg4[%c2_406, %c0_407, %c0_408] : memref<3x4x1xf32, #tpu.memory_space<vmem>>, vector<1x4x1xf32>
    %482 = vector.shape_cast %481 : vector<1x4x1xf32> to vector<4x1xf32>
    %483 = vector.broadcast %482 : vector<4x1xf32> to vector<4x256xf32>
    %484 = arith.mulf %483, %471 : vector<4x256xf32>
    %485 = arith.addf %480, %484 : vector<4x256xf32>
    %c2_409 = arith.constant 2 : index
    %c0_410 = arith.constant 0 : index
    %c0_411 = arith.constant 0 : index
    %486 = vector.load %arg6[%c2_409, %c0_410, %c0_411] : memref<8x4x256xf32, #tpu.memory_space<vmem>>, vector<1x4x256xf32>
    %487 = vector.shape_cast %486 : vector<1x4x256xf32> to vector<4x256xf32>
    %488 = vector.shape_cast %485 : vector<4x256xf32> to vector<1x4x256xf32>
    tpu.vector_store %arg6[%c2_409, %c0_410, %c0_411], %488 {strides = array<i32>} : memref<8x4x256xf32, #tpu.memory_space<vmem>>, vector<1x4x256xf32>,
    %c2_412 = arith.constant 2 : index
    %c0_413 = arith.constant 0 : index
    %c0_414 = arith.constant 0 : index
    %489 = vector.load %arg7[%c2_412, %c0_413, %c0_414] : memref<7x4x256xf32, #tpu.memory_space<vmem>>, vector<1x4x256xf32>
    %490 = vector.shape_cast %489 : vector<1x4x256xf32> to vector<4x256xf32>
    %c4_415 = arith.constant 4 : index
    %c0_416 = arith.constant 0 : index
    %c0_417 = arith.constant 0 : index
    %491 = vector.load %arg7[%c4_415, %c0_416, %c0_417] : memref<7x4x256xf32, #tpu.memory_space<vmem>>, vector<1x4x256xf32>
    %492 = vector.shape_cast %491 : vector<1x4x256xf32> to vector<4x256xf32>
    %c0_418 = arith.constant 0 : index
    %c0_419 = arith.constant 0 : index
    %c0_420 = arith.constant 0 : index
    %493 = vector.load %arg4[%c0_418, %c0_419, %c0_420] : memref<3x4x1xf32, #tpu.memory_space<vmem>>, vector<1x4x1xf32>
    %494 = vector.shape_cast %493 : vector<1x4x1xf32> to vector<4x1xf32>
    %495 = vector.broadcast %494 : vector<4x1xf32> to vector<4x256xf32>
    %496 = arith.mulf %495, %490 : vector<4x256xf32>
    %c1_421 = arith.constant 1 : index
    %c0_422 = arith.constant 0 : index
    %c0_423 = arith.constant 0 : index
    %497 = vector.load %arg4[%c1_421, %c0_422, %c0_423] : memref<3x4x1xf32, #tpu.memory_space<vmem>>, vector<1x4x1xf32>
    %498 = vector.shape_cast %497 : vector<1x4x1xf32> to vector<4x1xf32>
    %499 = vector.broadcast %498 : vector<4x1xf32> to vector<4x256xf32>
    %500 = arith.mulf %499, %235 : vector<4x256xf32>
    %501 = arith.addf %496, %500 : vector<4x256xf32>
    %c2_424 = arith.constant 2 : index
    %c0_425 = arith.constant 0 : index
    %c0_426 = arith.constant 0 : index
    %502 = vector.load %arg4[%c2_424, %c0_425, %c0_426] : memref<3x4x1xf32, #tpu.memory_space<vmem>>, vector<1x4x1xf32>
    %503 = vector.shape_cast %502 : vector<1x4x1xf32> to vector<4x1xf32>
    %504 = vector.broadcast %503 : vector<4x1xf32> to vector<4x256xf32>
    %505 = arith.mulf %504, %492 : vector<4x256xf32>
    %506 = arith.addf %501, %505 : vector<4x256xf32>
    %c3_427 = arith.constant 3 : index
    %c0_428 = arith.constant 0 : index
    %c0_429 = arith.constant 0 : index
    %507 = vector.load %arg6[%c3_427, %c0_428, %c0_429] : memref<8x4x256xf32, #tpu.memory_space<vmem>>, vector<1x4x256xf32>
    %508 = vector.shape_cast %507 : vector<1x4x256xf32> to vector<4x256xf32>
    %509 = vector.shape_cast %506 : vector<4x256xf32> to vector<1x4x256xf32>
    tpu.vector_store %arg6[%c3_427, %c0_428, %c0_429], %509 {strides = array<i32>} : memref<8x4x256xf32, #tpu.memory_space<vmem>>, vector<1x4x256xf32>,
    %c4_430 = arith.constant 4 : index
    %c0_431 = arith.constant 0 : index
    %c0_432 = arith.constant 0 : index
    %510 = vector.load %arg7[%c4_430, %c0_431, %c0_432] : memref<7x4x256xf32, #tpu.memory_space<vmem>>, vector<1x4x256xf32>
    %511 = vector.shape_cast %510 : vector<1x4x256xf32> to vector<4x256xf32>
    %c3_433 = arith.constant 3 : index
    %c0_434 = arith.constant 0 : index
    %c0_435 = arith.constant 0 : index
    %512 = vector.load %arg7[%c3_433, %c0_434, %c0_435] : memref<7x4x256xf32, #tpu.memory_space<vmem>>, vector<1x4x256xf32>
    %513 = vector.shape_cast %512 : vector<1x4x256xf32> to vector<4x256xf32>
    %c0_436 = arith.constant 0 : index
    %c0_437 = arith.constant 0 : index
    %c0_438 = arith.constant 0 : index
    %514 = vector.load %arg4[%c0_436, %c0_437, %c0_438] : memref<3x4x1xf32, #tpu.memory_space<vmem>>, vector<1x4x1xf32>
    %515 = vector.shape_cast %514 : vector<1x4x1xf32> to vector<4x1xf32>
    %516 = vector.broadcast %515 : vector<4x1xf32> to vector<4x256xf32>
    %517 = arith.mulf %516, %511 : vector<4x256xf32>
    %c1_439 = arith.constant 1 : index
    %c0_440 = arith.constant 0 : index
    %c0_441 = arith.constant 0 : index
    %518 = vector.load %arg4[%c1_439, %c0_440, %c0_441] : memref<3x4x1xf32, #tpu.memory_space<vmem>>, vector<1x4x1xf32>
    %519 = vector.shape_cast %518 : vector<1x4x1xf32> to vector<4x1xf32>
    %520 = vector.broadcast %519 : vector<4x1xf32> to vector<4x256xf32>
    %521 = arith.mulf %520, %513 : vector<4x256xf32>
    %522 = arith.addf %517, %521 : vector<4x256xf32>
    %c2_442 = arith.constant 2 : index
    %c0_443 = arith.constant 0 : index
    %c0_444 = arith.constant 0 : index
    %523 = vector.load %arg4[%c2_442, %c0_443, %c0_444] : memref<3x4x1xf32, #tpu.memory_space<vmem>>, vector<1x4x1xf32>
    %524 = vector.shape_cast %523 : vector<1x4x1xf32> to vector<4x1xf32>
    %525 = vector.broadcast %524 : vector<4x1xf32> to vector<4x256xf32>
    %526 = arith.mulf %525, %283 : vector<4x256xf32>
    %527 = arith.addf %522, %526 : vector<4x256xf32>
    %c4_445 = arith.constant 4 : index
    %c0_446 = arith.constant 0 : index
    %c0_447 = arith.constant 0 : index
    %528 = vector.load %arg6[%c4_445, %c0_446, %c0_447] : memref<8x4x256xf32, #tpu.memory_space<vmem>>, vector<1x4x256xf32>
    %529 = vector.shape_cast %528 : vector<1x4x256xf32> to vector<4x256xf32>
    %530 = vector.shape_cast %527 : vector<4x256xf32> to vector<1x4x256xf32>
    tpu.vector_store %arg6[%c4_445, %c0_446, %c0_447], %530 {strides = array<i32>} : memref<8x4x256xf32, #tpu.memory_space<vmem>>, vector<1x4x256xf32>,
    %c5_448 = arith.constant 5 : index
    %c0_449 = arith.constant 0 : index
    %c0_450 = arith.constant 0 : index
    %531 = vector.load %arg7[%c5_448, %c0_449, %c0_450] : memref<7x4x256xf32, #tpu.memory_space<vmem>>, vector<1x4x256xf32>
    %532 = vector.shape_cast %531 : vector<1x4x256xf32> to vector<4x256xf32>
    %c4_451 = arith.constant 4 : index
    %c0_452 = arith.constant 0 : index
    %c0_453 = arith.constant 0 : index
    %533 = vector.load %arg7[%c4_451, %c0_452, %c0_453] : memref<7x4x256xf32, #tpu.memory_space<vmem>>, vector<1x4x256xf32>
    %534 = vector.shape_cast %533 : vector<1x4x256xf32> to vector<4x256xf32>
    %c0_454 = arith.constant 0 : index
    %c0_455 = arith.constant 0 : index
    %c0_456 = arith.constant 0 : index
    %535 = vector.load %arg4[%c0_454, %c0_455, %c0_456] : memref<3x4x1xf32, #tpu.memory_space<vmem>>, vector<1x4x1xf32>
    %536 = vector.shape_cast %535 : vector<1x4x1xf32> to vector<4x1xf32>
    %537 = vector.broadcast %536 : vector<4x1xf32> to vector<4x256xf32>
    %538 = arith.mulf %537, %283 : vector<4x256xf32>
    %c1_457 = arith.constant 1 : index
    %c0_458 = arith.constant 0 : index
    %c0_459 = arith.constant 0 : index
    %539 = vector.load %arg4[%c1_457, %c0_458, %c0_459] : memref<3x4x1xf32, #tpu.memory_space<vmem>>, vector<1x4x1xf32>
    %540 = vector.shape_cast %539 : vector<1x4x1xf32> to vector<4x1xf32>
    %541 = vector.broadcast %540 : vector<4x1xf32> to vector<4x256xf32>
    %542 = arith.mulf %541, %532 : vector<4x256xf32>
    %543 = arith.addf %538, %542 : vector<4x256xf32>
    %c2_460 = arith.constant 2 : index
    %c0_461 = arith.constant 0 : index
    %c0_462 = arith.constant 0 : index
    %544 = vector.load %arg4[%c2_460, %c0_461, %c0_462] : memref<3x4x1xf32, #tpu.memory_space<vmem>>, vector<1x4x1xf32>
    %545 = vector.shape_cast %544 : vector<1x4x1xf32> to vector<4x1xf32>
    %546 = vector.broadcast %545 : vector<4x1xf32> to vector<4x256xf32>
    %547 = arith.mulf %546, %534 : vector<4x256xf32>
    %548 = arith.addf %543, %547 : vector<4x256xf32>
    %c5_463 = arith.constant 5 : index
    %c0_464 = arith.constant 0 : index
    %c0_465 = arith.constant 0 : index
    %549 = vector.load %arg6[%c5_463, %c0_464, %c0_465] : memref<8x4x256xf32, #tpu.memory_space<vmem>>, vector<1x4x256xf32>
    %550 = vector.shape_cast %549 : vector<1x4x256xf32> to vector<4x256xf32>
    %551 = vector.shape_cast %548 : vector<4x256xf32> to vector<1x4x256xf32>
    tpu.vector_store %arg6[%c5_463, %c0_464, %c0_465], %551 {strides = array<i32>} : memref<8x4x256xf32, #tpu.memory_space<vmem>>, vector<1x4x256xf32>,
    %c4_466 = arith.constant 4 : index
    %c0_467 = arith.constant 0 : index
    %c0_468 = arith.constant 0 : index
    %552 = vector.load %arg7[%c4_466, %c0_467, %c0_468] : memref<7x4x256xf32, #tpu.memory_space<vmem>>, vector<1x4x256xf32>
    %553 = vector.shape_cast %552 : vector<1x4x256xf32> to vector<4x256xf32>
    %c6_469 = arith.constant 6 : index
    %c0_470 = arith.constant 0 : index
    %c0_471 = arith.constant 0 : index
    %554 = vector.load %arg7[%c6_469, %c0_470, %c0_471] : memref<7x4x256xf32, #tpu.memory_space<vmem>>, vector<1x4x256xf32>
    %555 = vector.shape_cast %554 : vector<1x4x256xf32> to vector<4x256xf32>
    %c0_472 = arith.constant 0 : index
    %c0_473 = arith.constant 0 : index
    %c0_474 = arith.constant 0 : index
    %556 = vector.load %arg4[%c0_472, %c0_473, %c0_474] : memref<3x4x1xf32, #tpu.memory_space<vmem>>, vector<1x4x1xf32>
    %557 = vector.shape_cast %556 : vector<1x4x1xf32> to vector<4x1xf32>
    %558 = vector.broadcast %557 : vector<4x1xf32> to vector<4x256xf32>
    %559 = arith.mulf %558, %553 : vector<4x256xf32>
    %c1_475 = arith.constant 1 : index
    %c0_476 = arith.constant 0 : index
    %c0_477 = arith.constant 0 : index
    %560 = vector.load %arg4[%c1_475, %c0_476, %c0_477] : memref<3x4x1xf32, #tpu.memory_space<vmem>>, vector<1x4x1xf32>
    %561 = vector.shape_cast %560 : vector<1x4x1xf32> to vector<4x1xf32>
    %562 = vector.broadcast %561 : vector<4x1xf32> to vector<4x256xf32>
    %563 = arith.mulf %562, %331 : vector<4x256xf32>
    %564 = arith.addf %559, %563 : vector<4x256xf32>
    %c2_478 = arith.constant 2 : index
    %c0_479 = arith.constant 0 : index
    %c0_480 = arith.constant 0 : index
    %565 = vector.load %arg4[%c2_478, %c0_479, %c0_480] : memref<3x4x1xf32, #tpu.memory_space<vmem>>, vector<1x4x1xf32>
    %566 = vector.shape_cast %565 : vector<1x4x1xf32> to vector<4x1xf32>
    %567 = vector.broadcast %566 : vector<4x1xf32> to vector<4x256xf32>
    %568 = arith.mulf %567, %555 : vector<4x256xf32>
    %569 = arith.addf %564, %568 : vector<4x256xf32>
    %c6_481 = arith.constant 6 : index
    %c0_482 = arith.constant 0 : index
    %c0_483 = arith.constant 0 : index
    %570 = vector.load %arg6[%c6_481, %c0_482, %c0_483] : memref<8x4x256xf32, #tpu.memory_space<vmem>>, vector<1x4x256xf32>
    %571 = vector.shape_cast %570 : vector<1x4x256xf32> to vector<4x256xf32>
    %572 = vector.shape_cast %569 : vector<4x256xf32> to vector<1x4x256xf32>
    tpu.vector_store %arg6[%c6_481, %c0_482, %c0_483], %572 {strides = array<i32>} : memref<8x4x256xf32, #tpu.memory_space<vmem>>, vector<1x4x256xf32>,
    %c6_484 = arith.constant 6 : index
    %c0_485 = arith.constant 0 : index
    %c0_486 = arith.constant 0 : index
    %573 = vector.load %arg7[%c6_484, %c0_485, %c0_486] : memref<7x4x256xf32, #tpu.memory_space<vmem>>, vector<1x4x256xf32>
    %574 = vector.shape_cast %573 : vector<1x4x256xf32> to vector<4x256xf32>
    %c5_487 = arith.constant 5 : index
    %c0_488 = arith.constant 0 : index
    %c0_489 = arith.constant 0 : index
    %575 = vector.load %arg7[%c5_487, %c0_488, %c0_489] : memref<7x4x256xf32, #tpu.memory_space<vmem>>, vector<1x4x256xf32>
    %576 = vector.shape_cast %575 : vector<1x4x256xf32> to vector<4x256xf32>
    %c0_490 = arith.constant 0 : index
    %c0_491 = arith.constant 0 : index
    %c0_492 = arith.constant 0 : index
    %577 = vector.load %arg4[%c0_490, %c0_491, %c0_492] : memref<3x4x1xf32, #tpu.memory_space<vmem>>, vector<1x4x1xf32>
    %578 = vector.shape_cast %577 : vector<1x4x1xf32> to vector<4x1xf32>
    %579 = vector.broadcast %578 : vector<4x1xf32> to vector<4x256xf32>
    %580 = arith.mulf %579, %574 : vector<4x256xf32>
    %c1_493 = arith.constant 1 : index
    %c0_494 = arith.constant 0 : index
    %c0_495 = arith.constant 0 : index
    %581 = vector.load %arg4[%c1_493, %c0_494, %c0_495] : memref<3x4x1xf32, #tpu.memory_space<vmem>>, vector<1x4x1xf32>
    %582 = vector.shape_cast %581 : vector<1x4x1xf32> to vector<4x1xf32>
    %583 = vector.broadcast %582 : vector<4x1xf32> to vector<4x256xf32>
    %584 = arith.mulf %583, %576 : vector<4x256xf32>
    %585 = arith.addf %580, %584 : vector<4x256xf32>
    %c2_496 = arith.constant 2 : index
    %c0_497 = arith.constant 0 : index
    %c0_498 = arith.constant 0 : index
    %586 = vector.load %arg4[%c2_496, %c0_497, %c0_498] : memref<3x4x1xf32, #tpu.memory_space<vmem>>, vector<1x4x1xf32>
    %587 = vector.shape_cast %586 : vector<1x4x1xf32> to vector<4x1xf32>
    %588 = vector.broadcast %587 : vector<4x1xf32> to vector<4x256xf32>
    %589 = arith.mulf %588, %379 : vector<4x256xf32>
    %590 = arith.addf %585, %589 : vector<4x256xf32>
    %c7_499 = arith.constant 7 : index
    %c0_500 = arith.constant 0 : index
    %c0_501 = arith.constant 0 : index
    %591 = vector.load %arg6[%c7_499, %c0_500, %c0_501] : memref<8x4x256xf32, #tpu.memory_space<vmem>>, vector<1x4x256xf32>
    %592 = vector.shape_cast %591 : vector<1x4x256xf32> to vector<4x256xf32>
    %593 = vector.shape_cast %590 : vector<4x256xf32> to vector<1x4x256xf32>
    tpu.vector_store %arg6[%c7_499, %c0_500, %c0_501], %593 {strides = array<i32>} : memref<8x4x256xf32, #tpu.memory_space<vmem>>, vector<1x4x256xf32>,
    return
  }
  func.func @transform_0(%arg0: i32, %arg1: i32) -> (i32, i32, i32) {
    %c0_i32 = arith.constant 0 : i32
    %c0_i32_0 = arith.constant 0 : i32
    %c0_i32_1 = arith.constant 0 : i32
    %c0_i32_2 = arith.constant 0 : i32
    return %c0_i32, %c0_i32_0, %c0_i32_1 : i32, i32, i32
  }
  func.func @transform_1(%arg0: i32, %arg1: i32) -> (i32, i32, i32) {
    %c0_i32 = arith.constant 0 : i32
    %c0_i32_0 = arith.constant 0 : i32
    %c0_i32_1 = arith.constant 0 : i32
    return %c0_i32, %arg1, %c0_i32_0 : i32, i32, i32
  }
  func.func @transform_2(%arg0: i32, %arg1: i32) -> (i32, i32, i32) {
    %c0_i32 = arith.constant 0 : i32
    %c0_i32_0 = arith.constant 0 : i32
    %c0_i32_1 = arith.constant 0 : i32
    return %c0_i32, %arg1, %c0_i32_0 : i32, i32, i32
  }
  func.func @transform_3(%arg0: i32, %arg1: i32) -> (i32, i32, i32, i32) {
    %c0_i32 = arith.constant 0 : i32
    %c0_i32_0 = arith.constant 0 : i32
    %c0_i32_1 = arith.constant 0 : i32
    return %arg0, %c0_i32, %arg1, %c0_i32_0 : i32, i32, i32, i32
  }
  func.func @transform_4(%arg0: i32, %arg1: i32) -> (i32, i32, i32) {
    %c0_i32 = arith.constant 0 : i32
    %c0_i32_0 = arith.constant 0 : i32
    return %arg0, %arg1, %c0_i32 : i32, i32, i32
  }
}

</mosaic_0001>

<bundles_post_ra>
// kernel: fhgc_forward.1
= control target key start
LH: loop header
LB: loop body
LE: loop exit
PB: predicated region body
PF: predicated region fallthrough
CT: control target
= control target key end

     0   :  { %s1950_s15 = smov 0   ;;  %s1952_s16 = smov 0   ;;  %s3001_s0 = inlined_call_operand.vmem [shape: f32[9,1,256], index: 0, kind: input, shape index: {}]   ;;  %s3002_s1 = inlined_call_operand.vmem [shape: f32[9,4,1], index: 1, kind: input, shape index: {}]   ;;  %s3003_s2 = inlined_call_operand.vmem [shape: f32[3,4,1], index: 2, kind: input, shape index: {}]   ;;  %s3004_s3 = inlined_call_operand.vmem [shape: f32[2,8,4,256], index: 3, kind: input, shape index: {}]   ;;  %s3005_s4 = inlined_call_operand.vmem [shape: f32[16,4,256], index: 4, kind: output, shape index: {}]  }
   0x1   :  { %s1954_s17 = smov 0  }
   0x2 LB: > { %s26_s18 = sadd.s32 1, %s1910_s16  ;;  %p1788_p0 = scmp.ge.s32.totalorder %s1914_s17, 1  ;;  %s1914_s17 = sphi %s1954_s17, %s14_s17   ;;  %s1910_s16 = sphi %s1952_s16, %s3051_s16   ;;  %s1906_s15 = sphi %s1950_s15, %s3050_s15  }
   0x3   : > { %p28_p1 = scmp.ge.s32.totalorder %s26_s18, 2  ;;  %p200_p2 = scmp.lt.s32.totalorder %s1914_s17, 3 }
   0x5   : > { %s3053_s18 = smov (%p28_p1, %s26_s18), 0  ;;  %p201_p3 = pnand %p1788_p0, %p200_p2 }
   0x7   : > { %204 = sbr.rel (%p201_p3) target bundleno = 439 (0x1b7), region = 36 }
   0xe   : > { %v1796_v0 = vld [vmem:[%s3002_s1 + $0x8] sm:$0xf]  ;;  %v271_v1 = vld [vmem:[%s3002_s1] sm:$0xf]  ;;  %v1916_v2 = vmov 0   ;;  %p251_p4 = scmp.lt.s32.totalorder %s1906_s15, 1  ;;  %v279_v58 = vlaneseq }
   0xf   : > { %1877 = vset.pattern.permute.xlu1 %v1916_v2  ;;  %1876 = vset.pattern.permute.xlu0 %v1916_v2  ;;  %v1798_v3 = vld [vmem:[%s3002_s1 + $0xc] sm:$0xf]  ;;  %v1794_v4 = vld [vmem:[%s3002_s1 + $0x4] sm:$0xf]  ;;  %v1802_v5 = vld [vmem:[%s3002_s1 + $0x14] sm:$0xf] }
  0x10   : > { %330 = vperm.xlu1 %1877, %v1796_v0   ;;  %275 = vperm.xlu0 %1876, %v271_v1   ;;  %s252_s27 = scalar_select %p251_p4, %s1906_s15, 1  ;;  %v1800_v6 = vld [vmem:[%s3002_s1 + $0x10] sm:$0xf]  ;;  %v1806_v7 = vld [vmem:[%s3002_s1 + $0x1c] sm:$0xf]  ;;  %v280_v61 = vshrl.u32 %v279_v58, 7 }
  0x11   : > { %v1804_v8 = vld [vmem:[%s3002_s1 + $0x18] sm:$0xf]  ;;  %v1808_v9 = vld [vmem:[%s3002_s1 + $0x20] sm:$0xf]  ;;  %s1917_s20 = smov 34   ;;  %s1918_s21 = smov 32  }
  0x12   : > { %s1841_s6 = sshll.u32 %s252_s27, 6  ;;  %s1919_s22 = smov 30   ;;  %v2282_v0 = vsub.s32 0, %v280_v61  ;;  %v2284_v1 = vsub.s32 1, %v280_v61  ;;  %v1797_v2 = vld [vmem:[%s3001_s0 + $0x4] sm:$0x3] }
  0x13   : > { %s1999_s13 = scalar_lea.vmem %s3004_s3, %s1841_s6  ;;  %s1920_s23 = smov 2  }
  0x14   : > { %358 = vperm.xlu1 %1877, %v1798_v3   ;;  %302 = vperm.xlu0 %1876, %v1794_v4   ;;  %v520_v10 = vld [vmem:[%s1999_s13] sm:$0xff]  ;;  %s1921_s24 = smov 126   ;;  %s1922_s25 = smov 98   ;;  %v1810_v12 = vld [vmem:[%s1999_s13 + $0x8] sm:$0xff]  ;;  %v2047_v14 = vld [vmem:[%s1999_s13 + $0x10] sm:$0xff] }
  0x15   : > { %v522_v11 = vcombine.high %v520_v10, %v520_v10  ;;  %s1923_s26 = smov 96   ;;  %s1924_s27 = smov 94   ;;  %v2023_v13 = vcombine.high %v1810_v12, %v1810_v12  ;;  %v2055_v15 = vcombine.high %v2047_v14, %v2047_v14  ;;  %v2086_v16 = vld [vmem:[%s1999_s13 + $0x18] sm:$0xff]  ;;  %v2145_v28 = vld [vmem:[%s1999_s13 + $0x20] sm:$0xff]  ;;  %v2216_v46 = vld [vmem:[%s1999_s13 + $0x28] sm:$0xff] }
  0x16   : > { %v2094_v17 = vcombine.high %v2086_v16, %v2086_v16  ;;  %v2153_v29 = vcombine.high %v2145_v28, %v2145_v28  ;;  %v2224_v47 = vcombine.high %v2216_v46, %v2216_v46 }
  0x17   : > { %3022 = vst [vmem:[#allocation4_spill] sm:$0xff] %v2023_v13  ;;  %3023 = vst [vmem:[#allocation5_spill] sm:$0xff] %v2055_v15 }
  0x18   : > { %414 = vperm.xlu1 %1877, %v1802_v5   ;;  %386 = vperm.xlu0 %1876, %v1800_v6   ;;  %3024 = vst [vmem:[#allocation6_spill] sm:$0xff] %v2094_v17  ;;  %3025 = vst [vmem:[#allocation7_spill] sm:$0xff] %v2153_v29  ;;  %v2292_v5 = vld [vmem:[%s1999_s13 + $0x30] sm:$0xff]  ;;  %v272_v6 = vld [vmem:[%s3001_s0] sm:$0x3] }
  0x19   : > { %3028 = vst [vmem:[#allocation10_spill] sm:$0xff] %v2224_v47  ;;  %v282_v61 = vrot.slane %v272_v6, %v2282_v0 }
  0x1c   : > { %470 = vperm.xlu1 %1877, %v1806_v7   ;;  %442 = vperm.xlu0 %1876, %v1804_v8   ;;  %v1795_v7 = vld [vmem:[%s3001_s0 + $0x2] sm:$0x3]  ;;  %v2306_v8 = vcombine.high %v2292_v5, %v2292_v5 }
  0x20   : > { %498 = vperm.xlu0 %1876, %v1808_v9   ;;  %524 = vrot.lane.b32.xlu1 %v520_v10, %s1917_s20  ;;  %v337_v9 = vrot.slane %v1797_v2, %v2282_v0 }
  0x24   : > { %539 = vrot.lane.b32.xlu1 %v520_v10, %s1918_s21  ;;  %526 = vrot.lane.b32.xlu0 %v522_v11, %s1917_s20 }
  0x28   : > { %553 = vrot.lane.b32.xlu1 %v520_v10, %s1919_s22  ;;  %541 = vrot.lane.b32.xlu0 %v522_v11, %s1918_s21 }
  0x2c   : > { %567 = vrot.lane.b32.xlu1 %v520_v10, %s1920_s23  ;;  %555 = vrot.lane.b32.xlu0 %v522_v11, %s1919_s22 }
  0x30   : > { %584 = vrot.lane.b32.xlu1 %v520_v10, %s1921_s24  ;;  %569 = vrot.lane.b32.xlu0 %v522_v11, %s1920_s23 }
  0x34   : > { %598 = vrot.lane.b32.xlu1 %v520_v10, %s1922_s25  ;;  %586 = vrot.lane.b32.xlu0 %v522_v11, %s1921_s24 }
  0x38   : > { %612 = vrot.lane.b32.xlu1 %v520_v10, %s1923_s26  ;;  %600 = vrot.lane.b32.xlu0 %v522_v11, %s1922_s25 }
  0x3c   : > { %626 = vrot.lane.b32.xlu1 %v520_v10, %s1924_s27  ;;  %614 = vrot.lane.b32.xlu0 %v522_v11, %s1923_s26  ;;  %v341_v10 = vrot.slane %v1797_v2, %v2284_v1 }
  0x40   : > { %646 = vrot.lane.b32.xlu1 %v1810_v12, %s1917_s20  ;;  %628 = vrot.lane.b32.xlu0 %v522_v11, %s1924_s27  ;;  %v1799_v11 = vld [vmem:[%s3001_s0 + $0x6] sm:$0x3] }
  0x41   : > { %v365_v2 = vrot.slane %v1799_v11, %v2282_v0 }
  0x44   : > { %658 = vrot.lane.b32.xlu1 %v1810_v12, %s1918_s21  ;;  %648 = vrot.lane.b32.xlu0 %v2023_v13, %s1917_s20 }
  0x48   : > { %671 = vrot.lane.b32.xlu1 %v1810_v12, %s1919_s22  ;;  %660 = vrot.lane.b32.xlu0 %v2023_v13, %s1918_s21 }
  0x4c   : > { %684 = vrot.lane.b32.xlu1 %v1810_v12, %s1920_s23  ;;  %673 = vrot.lane.b32.xlu0 %v2023_v13, %s1919_s22 }
  0x50   : > { %700 = vrot.lane.b32.xlu1 %v1810_v12, %s1921_s24  ;;  %686 = vrot.lane.b32.xlu0 %v2023_v13, %s1920_s23 }
  0x54   : > { %713 = vrot.lane.b32.xlu1 %v1810_v12, %s1922_s25  ;;  %702 = vrot.lane.b32.xlu0 %v2023_v13, %s1921_s24 }
  0x58   : > { %726 = vrot.lane.b32.xlu1 %v1810_v12, %s1923_s26  ;;  %715 = vrot.lane.b32.xlu0 %v2023_v13, %s1922_s25 }
  0x5c   : > { %739 = vrot.lane.b32.xlu1 %v1810_v12, %s1924_s27  ;;  %728 = vrot.lane.b32.xlu0 %v2023_v13, %s1923_s26  ;;  %v2313_v12 = vand.u32 127, %v279_v58 }
  0x5e   : > { %vm530_vm0 = vcmp.lt.s32.totalorder %v2313_v12, 34  ;;  %vm543_vm1 = vcmp.lt.s32.totalorder %v2313_v12, 32  ;;  %vm557_vm2 = vcmp.lt.s32.totalorder %v2313_v12, 30  ;;  %vm571_vm3 = vcmp.lt.s32.totalorder %v2313_v12, 2 }
  0x5f   : > { %vm588_vm4 = vcmp.lt.s32.totalorder %v2313_v12, 126  ;;  %vm602_vm5 = vcmp.lt.s32.totalorder %v2313_v12, 98  ;;  %vm616_vm6 = vcmp.lt.s32.totalorder %v2313_v12, 96  ;;  %vm630_vm7 = vcmp.lt.s32.totalorder %v2313_v12, 94 }
  0x60   : > { %759 = vrot.lane.b32.xlu1 %v2047_v14, %s1917_s20  ;;  %741 = vrot.lane.b32.xlu0 %v2023_v13, %s1924_s27 }
  0x64   : > { %771 = vrot.lane.b32.xlu1 %v2047_v14, %s1918_s21  ;;  %761 = vrot.lane.b32.xlu0 %v2055_v15, %s1917_s20 }
  0x68   : > { %784 = vrot.lane.b32.xlu1 %v2047_v14, %s1919_s22  ;;  %773 = vrot.lane.b32.xlu0 %v2055_v15, %s1918_s21 }
  0x6c   : > { %797 = vrot.lane.b32.xlu1 %v2047_v14, %s1920_s23  ;;  %786 = vrot.lane.b32.xlu0 %v2055_v15, %s1919_s22 }
  0x70   : > { %813 = vrot.lane.b32.xlu1 %v2047_v14, %s1921_s24  ;;  %799 = vrot.lane.b32.xlu0 %v2055_v15, %s1920_s23 }
  0x74   : > { %826 = vrot.lane.b32.xlu1 %v2047_v14, %s1922_s25  ;;  %815 = vrot.lane.b32.xlu0 %v2055_v15, %s1921_s24 }
  0x78   : > { %839 = vrot.lane.b32.xlu1 %v2047_v14, %s1923_s26  ;;  %828 = vrot.lane.b32.xlu0 %v2055_v15, %s1922_s25 }
  0x7c   : > { %852 = vrot.lane.b32.xlu1 %v2047_v14, %s1924_s27  ;;  %841 = vrot.lane.b32.xlu0 %v2055_v15, %s1923_s26 }
  0x80   : > { %872 = vrot.lane.b32.xlu1 %v2086_v16, %s1917_s20  ;;  %854 = vrot.lane.b32.xlu0 %v2055_v15, %s1924_s27 }
  0x84   : > { %884 = vrot.lane.b32.xlu1 %v2086_v16, %s1918_s21  ;;  %874 = vrot.lane.b32.xlu0 %v2094_v17, %s1917_s20 }
  0x88   : > { %897 = vrot.lane.b32.xlu1 %v2086_v16, %s1919_s22  ;;  %886 = vrot.lane.b32.xlu0 %v2094_v17, %s1918_s21 }
  0x8c   : > { %910 = vrot.lane.b32.xlu1 %v2086_v16, %s1920_s23  ;;  %899 = vrot.lane.b32.xlu0 %v2094_v17, %s1919_s22 }
  0x8f   : > { %v2108_v18 = vpop.permute.xlu1 %330  ;;  %v2110_v19 = vpop.permute.xlu0 %275 }
  0x90   : > { %926 = vrot.lane.b32.xlu1 %v2086_v16, %s1921_s24  ;;  %912 = vrot.lane.b32.xlu0 %v2094_v17, %s1920_s23  ;;  %v344_v58 = vmul.f32 %v337_v9, %v2108_v18 }
  0x93   : > { %v2116_v20 = vpop.permute.xlu1 %358  ;;  %v2118_v21 = vpop.permute.xlu0 %302 }
  0x94   : > { %939 = vrot.lane.b32.xlu1 %v2086_v16, %s1922_s25  ;;  %928 = vrot.lane.b32.xlu0 %v2094_v17, %s1921_s24 }
  0x97   : > { %v2124_v22 = vpop.permute.xlu1 %414  ;;  %v2126_v23 = vpop.permute.xlu0 %386 }
  0x98   : > { %952 = vrot.lane.b32.xlu1 %v2086_v16, %s1923_s26  ;;  %941 = vrot.lane.b32.xlu0 %v2094_v17, %s1922_s25 }
  0x9b   : > { %v2132_v24 = vpop.permute.xlu1 %470  ;;  %v2134_v25 = vpop.permute.xlu0 %442 }
  0x9c   : > { %965 = vrot.lane.b32.xlu1 %v2086_v16, %s1924_s27  ;;  %954 = vrot.lane.b32.xlu0 %v2094_v17, %s1923_s26 }
  0x9f   : > { %v2140_v26 = vpop.permute.xlu0 %498  ;;  %v2142_v27 = vpop.permute.xlu1 %524 }
  0xa0   : > { %985 = vrot.lane.b32.xlu1 %v2145_v28, %s1917_s20  ;;  %967 = vrot.lane.b32.xlu0 %v2094_v17, %s1924_s27  ;;  %v313_v17 = vrot.slane %v1795_v7, %v2284_v1 }
  0xa3   : > { %v2155_v30 = vpop.permute.xlu1 %539  ;;  %v2157_v31 = vpop.permute.xlu0 %526 }
  0xa4   : > { %997 = vrot.lane.b32.xlu1 %v2145_v28, %s1918_s21  ;;  %987 = vrot.lane.b32.xlu0 %v2153_v29, %s1917_s20 }
  0xa7   : > { %v2163_v32 = vpop.permute.xlu1 %553  ;;  %v2165_v33 = vpop.permute.xlu0 %541 }
  0xa8   : > { %1010 = vrot.lane.b32.xlu1 %v2145_v28, %s1919_s22  ;;  %999 = vrot.lane.b32.xlu0 %v2153_v29, %s1918_s21 }
  0xab   : > { %v2171_v34 = vpop.permute.xlu1 %567  ;;  %v2173_v35 = vpop.permute.xlu0 %555 }
  0xac   : > { %1023 = vrot.lane.b32.xlu1 %v2145_v28, %s1920_s23  ;;  %1012 = vrot.lane.b32.xlu0 %v2153_v29, %s1919_s22 }
  0xaf   : > { %v2179_v36 = vpop.permute.xlu1 %584  ;;  %v2181_v37 = vpop.permute.xlu0 %569 }
  0xb0   : > { %1039 = vrot.lane.b32.xlu1 %v2145_v28, %s1921_s24  ;;  %1025 = vrot.lane.b32.xlu0 %v2153_v29, %s1920_s23 }
  0xb3   : > { %v2187_v38 = vpop.permute.xlu1 %598  ;;  %v2189_v39 = vpop.permute.xlu0 %586 }
  0xb4   : > { %1052 = vrot.lane.b32.xlu1 %v2145_v28, %s1922_s25  ;;  %1041 = vrot.lane.b32.xlu0 %v2153_v29, %s1921_s24 }
  0xb7   : > { %v2195_v40 = vpop.permute.xlu1 %612  ;;  %v2197_v41 = vpop.permute.xlu0 %600 }
  0xb8   : > { %1065 = vrot.lane.b32.xlu1 %v2145_v28, %s1923_s26  ;;  %1054 = vrot.lane.b32.xlu0 %v2153_v29, %s1922_s25 }
  0xbb   : > { %v2203_v42 = vpop.permute.xlu1 %626  ;;  %v2205_v43 = vpop.permute.xlu0 %614 }
  0xbc   : > { %3026 = vst [vmem:[#allocation8_spill] sm:$0xff] %v2203_v42  ;;  %1078 = vrot.lane.b32.xlu1 %v2145_v28, %s1924_s27  ;;  %1067 = vrot.lane.b32.xlu0 %v2153_v29, %s1923_s26 }
  0xbf   : > { %v2211_v44 = vpop.permute.xlu1 %646  ;;  %v2213_v45 = vpop.permute.xlu0 %628 }
  0xc0   : > { %3027 = vst [vmem:[#allocation9_spill] sm:$0xff] %v2213_v45  ;;  %1098 = vrot.lane.b32.xlu1 %v2216_v46, %s1917_s20  ;;  %1080 = vrot.lane.b32.xlu0 %v2153_v29, %s1924_s27  ;;  %v286_v29 = vrot.slane %v272_v6, %v2284_v1  ;;  %v345_v6 = vmul.f32 %v341_v10, %v2108_v18  ;;  %v1803_v18 = vld [vmem:[%s3001_s0 + $0xa] sm:$0x3] }
  0xc1   : > { %v372_v45 = vmul.f32 %v365_v2, %v2116_v20 }
  0xc3   : > { %v2226_v48 = vpop.permute.xlu1 %658  ;;  %v2228_v49 = vpop.permute.xlu0 %648 }
  0xc4   : > { %1110 = vrot.lane.b32.xlu1 %v2216_v46, %s1918_s21  ;;  %1100 = vrot.lane.b32.xlu0 %v2224_v47, %s1917_s20 }
  0xc7   : > { %v2234_v50 = vpop.permute.xlu1 %671  ;;  %v2236_v51 = vpop.permute.xlu0 %660 }
  0xc8   : > { %1123 = vrot.lane.b32.xlu1 %v2216_v46, %s1919_s22  ;;  %1112 = vrot.lane.b32.xlu0 %v2224_v47, %s1918_s21 }
  0xcb   : > { %v2242_v52 = vpop.permute.xlu1 %684  ;;  %v2244_v53 = vpop.permute.xlu0 %673 }
  0xcc   : > { %1136 = vrot.lane.b32.xlu1 %v2216_v46, %s1920_s23  ;;  %1125 = vrot.lane.b32.xlu0 %v2224_v47, %s1919_s22 }
  0xcf   : > { %v2250_v54 = vpop.permute.xlu1 %700  ;;  %v2252_v55 = vpop.permute.xlu0 %686 }
  0xd0   : > { %3029 = vst [vmem:[#allocation11_spill] sm:$0xff] %v2250_v54  ;;  %1152 = vrot.lane.b32.xlu1 %v2216_v46, %s1921_s24  ;;  %1138 = vrot.lane.b32.xlu0 %v2224_v47, %s1920_s23 }
  0xd3   : > { %v2258_v56 = vpop.permute.xlu1 %713  ;;  %v2260_v57 = vpop.permute.xlu0 %702 }
  0xd4   : > { %3030 = vst [vmem:[#allocation12_spill] sm:$0xff] %v2258_v56  ;;  %1165 = vrot.lane.b32.xlu1 %v2216_v46, %s1922_s25  ;;  %1154 = vrot.lane.b32.xlu0 %v2224_v47, %s1921_s24 }
  0xd7   : > { %v2266_v59 = vpop.permute.xlu1 %726  ;;  %v2268_v60 = vpop.permute.xlu0 %715 }
  0xd8   : > { %3031 = vst [vmem:[#allocation13_spill] sm:$0xff] %v2266_v59  ;;  %3032 = vst [vmem:[#allocation14_spill] sm:$0xff] %v2268_v60  ;;  %1178 = vrot.lane.b32.xlu1 %v2216_v46, %s1923_s26  ;;  %1167 = vrot.lane.b32.xlu0 %v2224_v47, %s1922_s25  ;;  %v290_v59 = vmul.f32 %v286_v29, %v2110_v19 }
  0xdb   : > { %v2274_v62 = vpop.permute.xlu1 %739  ;;  %v2276_v63 = vpop.permute.xlu0 %728 }
  0xdc   : > { %3033 = vst [vmem:[#allocation15_spill] sm:$0xff] %v2274_v62  ;;  %3034 = vst [vmem:[#allocation16_spill] sm:$0xff] %v2276_v63  ;;  %1191 = vrot.lane.b32.xlu1 %v2216_v46, %s1924_s27  ;;  %1180 = vrot.lane.b32.xlu0 %v2224_v47, %s1923_s26  ;;  %v369_v62 = vrot.slane %v1799_v11, %v2284_v1  ;;  %v317_v63 = vmul.f32 %v313_v17, %v2118_v21 }
  0xde   : > { %v373_v54 = vmul.f32 %v369_v62, %v2116_v20  ;;  %v1807_v62 = vld [vmem:[%s3001_s0 + $0xe] sm:$0x3] }
  0xdf   : > { %v760_v3 = vpop.permute.xlu1 %759  ;;  %v2289_v4 = vpop.permute.xlu0 %741 }
  0xe0   : > { %3035 = vst [vmem:[#allocation17_spill] sm:$0xff] %v2289_v4  ;;  %1211 = vrot.lane.b32.xlu1 %v2292_v5, %s1917_s20  ;;  %1193 = vrot.lane.b32.xlu0 %v2224_v47, %s1924_s27  ;;  %v309_v47 = vrot.slane %v1795_v7, %v2282_v0  ;;  %v1801_v7 = vld [vmem:[%s3001_s0 + $0x8] sm:$0x3]  ;;  %v289_v4 = vmul.f32 %v282_v61, %v2110_v19 }
  0xe1   : > { %v393_v17 = vrot.slane %v1801_v7, %v2282_v0 }
  0xe2   : > { %v316_v11 = vmul.f32 %v309_v47, %v2118_v21  ;;  %v397_v21 = vrot.slane %v1801_v7, %v2284_v1  ;;  %v421_v47 = vrot.slane %v1803_v18, %v2282_v0  ;;  %v1805_v7 = vld [vmem:[%s3001_s0 + $0xc] sm:$0x3] }
  0xe3   : > { %v772_v15 = vpop.permute.xlu1 %771  ;;  %v762_v13 = vpop.permute.xlu0 %761  ;;  %v449_v20 = vrot.slane %v1805_v7, %v2282_v0 }
  0xe4   : > { %1223 = vrot.lane.b32.xlu1 %v2292_v5, %s1918_s21  ;;  %1213 = vrot.lane.b32.xlu0 %v2306_v8, %s1917_s20  ;;  %v763_v56 = vsel %vm530_vm0, %v760_v3, %v762_v13  ;;  %v764_v60 = vsel %vm530_vm0, %v762_v13, %v760_v3  ;;  %v425_v13 = vrot.slane %v1803_v18, %v2284_v1 }
  0xe5   : > { %v2356_v3 = vcombine.low %v344_v58, %v345_v6 }
  0xe7   : > { %v785_v9 = vpop.permute.xlu1 %784  ;;  %v774_v10 = vpop.permute.xlu0 %773 }
  0xe8   : > { %v775_v61 = vsel %vm543_vm1, %v772_v15, %v774_v10  ;;  %v776_v19 = vsel %vm543_vm1, %v774_v10, %v772_v15  ;;  %1236 = vrot.lane.b32.xlu1 %v2292_v5, %s1919_s22  ;;  %1225 = vrot.lane.b32.xlu0 %v2306_v8, %s1918_s21  ;;  %v2358_v15 = vcombine.low %v289_v4, %v290_v59 }
  0xe9   : > { %v780_v29 = vcombine.low %v776_v19, %v775_v61  ;;  %v2360_v10 = vcombine.low %v316_v11, %v317_v63  ;;  %v768_v61 = vcombine.low %v764_v60, %v763_v56  ;;  %v400_v63 = vmul.f32 %v393_v17, %v2126_v23 }
  0xea   : > { %v401_v4 = vmul.f32 %v397_v21, %v2126_v23  ;;  %v428_v11 = vmul.f32 %v421_v47, %v2124_v22  ;;  %v481_v47 = vrot.slane %v1807_v62, %v2284_v1 }
  0xeb   : > { %v798_v19 = vpop.permute.xlu1 %797  ;;  %v787_v42 = vpop.permute.xlu0 %786  ;;  %v782_v56 = vmul.f32 %v780_v29, %v2360_v10  ;;  %v770_v2 = vmul.f32 %v768_v61, %v2358_v15  ;;  %v2394_v29 = vcombine.low %v372_v45, %v373_v54  ;;  %v456_v54 = vmul.f32 %v449_v20, %v2134_v25 }
  0xec   : > { %v788_v18 = vsel %vm557_vm2, %v785_v9, %v787_v42  ;;  %v789_v59 = vsel %vm557_vm2, %v787_v42, %v785_v9  ;;  %1249 = vrot.lane.b32.xlu1 %v2292_v5, %s1920_s23  ;;  %1238 = vrot.lane.b32.xlu0 %v2306_v8, %s1919_s22  ;;  %v453_v42 = vrot.slane %v1805_v7, %v2284_v1 }
  0xed   : > { %v793_v60 = vcombine.low %v789_v59, %v788_v18  ;;  %v429_v9 = vmul.f32 %v425_v13, %v2124_v22  ;;  %v2396_v7 = vcombine.low %v400_v63, %v401_v4  ;;  %v783_v61 = vadd.f32 %v782_v56, %v770_v2  ;;  %v1809_v63 = vld [vmem:[%s3001_s0 + $0x10] sm:$0x3] }
  0xee   : > { %v477_v22 = vrot.slane %v1807_v62, %v2282_v0  ;;  %v457_v62 = vmul.f32 %v453_v42, %v2134_v25  ;;  %v485_v25 = vmul.f32 %v481_v47, %v2132_v24 }
  0xef   : > { %v795_v23 = vmul.f32 %v793_v60, %v2356_v3  ;;  %v814_v58 = vpop.permute.xlu1 %813  ;;  %v800_v6 = vpop.permute.xlu0 %799  ;;  %v2404_v45 = vcombine.low %v428_v11, %v429_v9 }
  0xf0   : > { %v801_v17 = vsel %vm571_vm3, %v798_v19, %v800_v6  ;;  %v802_v21 = vsel %vm571_vm3, %v800_v6, %v798_v19  ;;  %1265 = vrot.lane.b32.xlu1 %v2292_v5, %s1921_s24  ;;  %1251 = vrot.lane.b32.xlu0 %v2306_v8, %s1920_s23  ;;  %v505_v6 = vrot.slane %v1809_v63, %v2282_v0 }
  0xf1   : > { %v806_v18 = vcombine.low %v802_v21, %v801_v17  ;;  %v796_v13 = vadd.f32 %v795_v23, %v783_v61  ;;  %v811_v23 = vmul.f32 %v2047_v14, %v2396_v7  ;;  %v484_v21 = vmul.f32 %v477_v22, %v2132_v24 }
  0xf2   : > { %v2432_v0 = vcombine.low %v456_v54, %v457_v62  ;;  %v509_v61 = vrot.slane %v1809_v63, %v2284_v1  ;;  %v512_v1 = vmul.f32 %v505_v6, %v2140_v26 }
  0xf3   : > { %v808_v19 = vmul.f32 %v806_v18, %v2394_v29  ;;  %v827_v59 = vpop.permute.xlu1 %826  ;;  %v816_v60 = vpop.permute.xlu0 %815 }
  0xf4   : > { %v817_v4 = vsel %vm588_vm4, %v814_v58, %v816_v60  ;;  %v818_v56 = vsel %vm588_vm4, %v816_v60, %v814_v58  ;;  %1278 = vrot.lane.b32.xlu1 %v2292_v5, %s1922_s25  ;;  %1267 = vrot.lane.b32.xlu0 %v2306_v8, %s1921_s24  ;;  %v513_v54 = vmul.f32 %v509_v61, %v2140_v26 }
  0xf5   : > { %v809_v2 = vadd.f32 %v808_v19, %v796_v13  ;;  %v822_v20 = vcombine.low %v817_v4, %v818_v56  ;;  %v2439_v19 = vcombine.low %v484_v21, %v485_v25  ;;  %v1321_v56 = vld [vmem:[%s3003_s2] sm:$0xf] }
  0xf7   : > { %v812_v11 = vadd.f32 %v811_v23, %v809_v2  ;;  %v824_v58 = vmul.f32 %v822_v20, %v2404_v45  ;;  %v840_v9 = vpop.permute.xlu1 %839  ;;  %v829_v17 = vpop.permute.xlu0 %828  ;;  %v2460_v20 = vcombine.low %v512_v1, %v513_v54  ;;  %v1406_v54 = vld [vmem:[%s3003_s2] sm:$0xf] }
  0xf8   : > { %v830_v14 = vsel %vm602_vm5, %v827_v59, %v829_v17  ;;  %v831_v42 = vsel %vm602_vm5, %v829_v17, %v827_v59  ;;  %1291 = vrot.lane.b32.xlu1 %v2292_v5, %s1923_s26  ;;  %1280 = vrot.lane.b32.xlu0 %v2306_v8, %s1922_s25 }
  0xf9   : > { %v825_v18 = vadd.f32 %v824_v58, %v812_v11  ;;  %v835_v13 = vcombine.low %v830_v14, %v831_v42  ;;  %v1817_v58 = vld [vmem:[%s3003_s2 + $0x8] sm:$0xf] }
  0xfb   : > { %v837_v24 = vmul.f32 %v835_v13, %v2432_v0  ;;  %v853_v22 = vpop.permute.xlu1 %852  ;;  %v842_v47 = vpop.permute.xlu0 %841  ;;  %v1818_v13 = vld [vmem:[%s3003_s2 + $0x4] sm:$0xf] }
  0xfc   : > { %v843_v59 = vsel %vm616_vm6, %v840_v9, %v842_v47  ;;  %v844_v60 = vsel %vm616_vm6, %v842_v47, %v840_v9  ;;  %1304 = vrot.lane.b32.xlu1 %v2292_v5, %s1924_s27  ;;  %1293 = vrot.lane.b32.xlu0 %v2306_v8, %s1923_s26  ;;  %v1816_v9 = vld [vmem:[%s3003_s2 + $0x4] sm:$0xf] }
  0xfd   : > { %v838_v63 = vadd.f32 %v837_v24, %v825_v18  ;;  %v848_v4 = vcombine.low %v843_v59, %v844_v60  ;;  %v1364_v24 = vld [vmem:[%s3003_s2] sm:$0xf] }
  0xff   : > { %v850_v62 = vmul.f32 %v848_v4, %v2439_v19  ;;  %v873_v2 = vpop.permute.xlu1 %872  ;;  %v855_v23 = vpop.permute.xlu0 %854 }
 0x100   : > { %v856_v5 = vsel %vm630_vm7, %v853_v22, %v855_v23  ;;  %v857_v26 = vsel %vm630_vm7, %v855_v23, %v853_v22  ;;  %1324 = vperm.xlu1 %1877, %v1321_v56   ;;  %1306 = vrot.lane.b32.xlu0 %v2306_v8, %s1924_s27  ;;  %s1791_s27 = sshll.u32 %s1906_s15, 3 }
 0x101   : > { %v851_v6 = vadd.f32 %v850_v62, %v838_v63  ;;  %v861_v11 = vcombine.low %v856_v5, %v857_v26  ;;  %v1819_v63 = vld [vmem:[%s3003_s2 + $0x8] sm:$0xf]  ;;  %p261_p5 = scmp.lt.s32.totalorder %s1791_s27, 15 }
 0x103   : > { %v863_v17 = vmul.f32 %v861_v11, %v2460_v20  ;;  %v885_v21 = vpop.permute.xlu1 %884  ;;  %v875_v25 = vpop.permute.xlu0 %874  ;;  %v1448_v11 = vld [vmem:[%s3003_s2] sm:$0xf]  ;;  %s3055_s27 = smov (!%p261_p5, %s1791_s27), 15 }
 0x104   : > { %v876_v14 = vsel %vm530_vm0, %v873_v2, %v875_v25  ;;  %v877_v42 = vsel %vm530_vm0, %v875_v25, %v873_v2  ;;  %1347 = vperm.xlu1 %1877, %v1817_v58   ;;  %1336 = vperm.xlu0 %1876, %v1816_v9   ;;  %v1821_v58 = vld [vmem:[%s3003_s2 + $0x4] sm:$0xf]  ;;  %s1842_s15 = sshll.u32 %s3055_s27, 3 }
 0x105   : > { %v2475_v61 = vadd.f32 %v863_v17, %v851_v6  ;;  %v881_v18 = vcombine.low %v877_v42, %v876_v14  ;;  %s2893_s8 = scalar_lea.vmem %s3005_s4, %s1842_s15 }
 0x107   : > { %v898_v22 = vpop.permute.xlu1 %897  ;;  %v887_v47 = vpop.permute.xlu0 %886  ;;  %v883_v4 = vmul.f32 %v881_v18, %v2358_v15 }
 0x108   : > { %v888_v59 = vsel %vm543_vm1, %v885_v21, %v887_v47  ;;  %v889_v60 = vsel %vm543_vm1, %v887_v47, %v885_v21  ;;  %1378 = vperm.xlu1 %1877, %v1818_v13   ;;  %1367 = vperm.xlu0 %1876, %v1364_v24   ;;  %v1490_v13 = vld [vmem:[%s3003_s2] sm:$0xf]  ;;  %v1824_v24 = vld [vmem:[%s3003_s2 + $0x4] sm:$0xf] }
 0x109   : > { %v893_v1 = vcombine.low %v889_v60, %v888_v59 }
 0x10b   : > { %v895_v56 = vmul.f32 %v893_v1, %v2360_v10  ;;  %v911_v62 = vpop.permute.xlu1 %910  ;;  %v900_v2 = vpop.permute.xlu0 %899 }
 0x10c   : > { %v901_v23 = vsel %vm557_vm2, %v898_v22, %v900_v2  ;;  %v902_v5 = vsel %vm557_vm2, %v900_v2, %v898_v22  ;;  %1409 = vperm.xlu1 %1877, %v1406_v54   ;;  %1391 = vperm.xlu0 %1876, %v1819_v63   ;;  %v924_v63 = vmul.f32 %v2086_v16, %v2396_v7 }
 0x10d   : > { %v896_v26 = vadd.f32 %v895_v56, %v883_v4  ;;  %v906_v6 = vcombine.low %v902_v5, %v901_v23  ;;  %v1532_v56 = vld [vmem:[%s3003_s2] sm:$0xf] }
 0x10f   : > { %v908_v9 = vmul.f32 %v906_v6, %v2356_v3  ;;  %v927_v17 = vpop.permute.xlu1 %926  ;;  %v913_v21 = vpop.permute.xlu0 %912 }
 0x110   : > { %v914_v25 = vsel %vm571_vm3, %v911_v62, %v913_v21  ;;  %v915_v14 = vsel %vm571_vm3, %v913_v21, %v911_v62  ;;  %1451 = vperm.xlu1 %1877, %v1448_v11   ;;  %1417 = vperm.xlu0 %1876, %v1821_v58   ;;  %v1827_v62 = vld [vmem:[%s3003_s2 + $0x4] sm:$0xf] }
 0x111   : > { %v909_v42 = vadd.f32 %v908_v9, %v896_v26  ;;  %v919_v18 = vcombine.low %v915_v14, %v914_v25  ;;  %v1574_v9 = vld [vmem:[%s3003_s2] sm:$0xf] }
 0x113   : > { %v921_v22 = vmul.f32 %v919_v18, %v2394_v29  ;;  %v940_v47 = vpop.permute.xlu1 %939  ;;  %v929_v59 = vpop.permute.xlu0 %928 }
 0x114   : > { %v930_v60 = vsel %vm588_vm4, %v927_v17, %v929_v59  ;;  %v931_v1 = vsel %vm588_vm4, %v929_v59, %v927_v17  ;;  %1493 = vperm.xlu1 %1877, %v1490_v13   ;;  %1462 = vperm.xlu0 %1876, %v1824_v24   ;;  %v1830_v17 = vld [vmem:[%s3003_s2 + $0x4] sm:$0xf] }
 0x115   : > { %v922_v54 = vadd.f32 %v921_v22, %v909_v42  ;;  %v935_v4 = vcombine.low %v930_v60, %v931_v1  ;;  %v1616_v22 = vld [vmem:[%s3003_s2] sm:$0xf] }
 0x117   : > { %v925_v2 = vadd.f32 %v924_v63, %v922_v54  ;;  %v937_v23 = vmul.f32 %v935_v4, %v2404_v45  ;;  %v953_v5 = vpop.permute.xlu1 %952  ;;  %v942_v26 = vpop.permute.xlu0 %941 }
 0x118   : > { %v943_v6 = vsel %vm602_vm5, %v940_v47, %v942_v26  ;;  %v944_v16 = vsel %vm602_vm5, %v942_v26, %v940_v47  ;;  %1535 = vperm.xlu1 %1877, %v1532_v56   ;;  %1504 = vperm.xlu0 %1876, %v1827_v62   ;;  %v1833_v47 = vld [vmem:[%s3003_s2 + $0x4] sm:$0xf]  ;;  %v1822_v62 = vld [vmem:[%s3003_s2 + $0x8] sm:$0xf] }
 0x119   : > { %v938_v11 = vadd.f32 %v937_v23, %v925_v2  ;;  %v948_v58 = vcombine.low %v943_v6, %v944_v16  ;;  %v1836_v2 = vld [vmem:[%s3003_s2 + $0x4] sm:$0xf] }
 0x11b   : > { %v950_v21 = vmul.f32 %v948_v58, %v2432_v0  ;;  %v966_v25 = vpop.permute.xlu1 %965  ;;  %v955_v14 = vpop.permute.xlu0 %954  ;;  %v1828_v58 = vld [vmem:[%s3003_s2 + $0x8] sm:$0xf] }
 0x11c   : > { %v956_v42 = vsel %vm616_vm6, %v953_v5, %v955_v14  ;;  %v957_v18 = vsel %vm616_vm6, %v955_v14, %v953_v5  ;;  %1577 = vperm.xlu1 %1877, %v1574_v9   ;;  %1543 = vperm.xlu0 %1876, %v1830_v17   ;;  %v1825_v17 = vld [vmem:[%s3003_s2 + $0x8] sm:$0xf] }
 0x11d   : > { %v951_v13 = vadd.f32 %v950_v21, %v938_v11  ;;  %v961_v24 = vcombine.low %v956_v42, %v957_v18 }
 0x11f   : > { %v963_v59 = vmul.f32 %v961_v24, %v2439_v19  ;;  %v986_v60 = vpop.permute.xlu1 %985  ;;  %v968_v1 = vpop.permute.xlu0 %967  ;;  %v1831_v24 = vld [vmem:[%s3003_s2 + $0x8] sm:$0xf] }
 0x120   : > { %v969_v54 = vsel %vm630_vm7, %v966_v25, %v968_v1  ;;  %v970_v63 = vsel %vm630_vm7, %v968_v1, %v966_v25  ;;  %1619 = vperm.xlu1 %1877, %v1616_v22   ;;  %1588 = vperm.xlu0 %1876, %v1833_v47  }
 0x121   : > { %v964_v4 = vadd.f32 %v963_v59, %v951_v13  ;;  %v974_v56 = vcombine.low %v969_v54, %v970_v63  ;;  %v1834_v13 = vld [vmem:[%s3003_s2 + $0x8] sm:$0xf] }
 0x123   : > { %v976_v23 = vmul.f32 %v974_v56, %v2460_v20  ;;  %v998_v5 = vpop.permute.xlu1 %997  ;;  %v988_v26 = vpop.permute.xlu0 %987  ;;  %v1837_v56 = vld [vmem:[%s3003_s2 + $0x8] sm:$0xf] }
 0x124   : > { %v989_v6 = vsel %vm530_vm0, %v986_v60, %v988_v26  ;;  %v990_v16 = vsel %vm530_vm0, %v988_v26, %v986_v60  ;;  %1430 = vperm.xlu1 %1877, %v1822_v62   ;;  %1630 = vperm.xlu0 %1876, %v1836_v2  }
 0x125   : > { %v994_v11 = vcombine.low %v990_v16, %v989_v6  ;;  %v2570_v9 = vadd.f32 %v976_v23, %v964_v4 }
 0x127   : > { %v1011_v21 = vpop.permute.xlu1 %1010  ;;  %v1000_v25 = vpop.permute.xlu0 %999  ;;  %v996_v22 = vmul.f32 %v994_v11, %v2358_v15 }
 0x128   : > { %v1001_v14 = vsel %vm543_vm1, %v998_v5, %v1000_v25  ;;  %v1002_v42 = vsel %vm543_vm1, %v1000_v25, %v998_v5  ;;  %1517 = vperm.xlu1 %1877, %v1828_v58   ;;  %1472 = vperm.xlu0 %1876, %v1825_v17  }
 0x129   : > { %v1006_v18 = vcombine.low %v1002_v42, %v1001_v14  ;;  %v1037_v42 = vmul.f32 %v2145_v28, %v2396_v7 }
 0x12b   : > { %v1008_v47 = vmul.f32 %v1006_v18, %v2360_v10  ;;  %v1024_v59 = vpop.permute.xlu1 %1023  ;;  %v1013_v60 = vpop.permute.xlu0 %1012 }
 0x12c   : > { %v1014_v1 = vsel %vm557_vm2, %v1011_v21, %v1013_v60  ;;  %v1015_v54 = vsel %vm557_vm2, %v1013_v60, %v1011_v21  ;;  %1598 = vperm.xlu1 %1877, %v1834_v13   ;;  %1556 = vperm.xlu0 %1876, %v1831_v24  }
 0x12d   : > { %v1009_v63 = vadd.f32 %v1008_v47, %v996_v22  ;;  %v1019_v4 = vcombine.low %v1015_v54, %v1014_v1 }
 0x12f   : > { %v1021_v62 = vmul.f32 %v1019_v4, %v2356_v3  ;;  %v1040_v2 = vpop.permute.xlu1 %1039  ;;  %v1026_v23 = vpop.permute.xlu0 %1025 }
 0x130   : > { %v1027_v5 = vsel %vm571_vm3, %v1024_v59, %v1026_v23  ;;  %v1028_v26 = vsel %vm571_vm3, %v1026_v23, %v1024_v59  ;;  %1643 = vperm.xlu0 %1876, %v1837_v56  }
 0x131   : > { %v1022_v6 = vadd.f32 %v1021_v62, %v1009_v63  ;;  %v1032_v16 = vcombine.low %v1028_v26, %v1027_v5 }
 0x133   : > { %v1034_v11 = vmul.f32 %v1032_v16, %v2394_v29  ;;  %v1053_v58 = vpop.permute.xlu1 %1052  ;;  %v1042_v17 = vpop.permute.xlu0 %1041 }
 0x134   : > { %v1043_v21 = vsel %vm588_vm4, %v1040_v2, %v1042_v17  ;;  %v1044_v25 = vsel %vm588_vm4, %v1042_v17, %v1040_v2 }
 0x135   : > { %v1035_v14 = vadd.f32 %v1034_v11, %v1022_v6  ;;  %v1048_v18 = vcombine.low %v1043_v21, %v1044_v25 }
 0x137   : > { %v1038_v13 = vadd.f32 %v1037_v42, %v1035_v14  ;;  %v1050_v24 = vmul.f32 %v1048_v18, %v2404_v45  ;;  %v1066_v22 = vpop.permute.xlu1 %1065  ;;  %v1055_v47 = vpop.permute.xlu0 %1054 }
 0x138   : > { %v1056_v59 = vsel %vm602_vm5, %v1053_v58, %v1055_v47  ;;  %v1057_v60 = vsel %vm602_vm5, %v1055_v47, %v1053_v58 }
 0x139   : > { %v1051_v1 = vadd.f32 %v1050_v24, %v1038_v13  ;;  %v1061_v54 = vcombine.low %v1056_v59, %v1057_v60 }
 0x13b   : > { %v1063_v63 = vmul.f32 %v1061_v54, %v2432_v0  ;;  %v1079_v4 = vpop.permute.xlu1 %1078  ;;  %v1068_v56 = vpop.permute.xlu0 %1067 }
 0x13c   : > { %v1069_v28 = vsel %vm616_vm6, %v1066_v22, %v1068_v56  ;;  %v1070_v62 = vsel %vm616_vm6, %v1068_v56, %v1066_v22 }
 0x13d   : > { %v1064_v2 = vadd.f32 %v1063_v63, %v1051_v1  ;;  %v1074_v23 = vcombine.low %v1069_v28, %v1070_v62 }
 0x13f   : > { %v1076_v5 = vmul.f32 %v1074_v23, %v2439_v19  ;;  %v1099_v26 = vpop.permute.xlu1 %1098  ;;  %v1081_v6 = vpop.permute.xlu0 %1080 }
 0x140   : > { %v1082_v16 = vsel %vm630_vm7, %v1079_v4, %v1081_v6  ;;  %v1083_v11 = vsel %vm630_vm7, %v1081_v6, %v1079_v4 }
 0x141   : > { %v1077_v58 = vadd.f32 %v1076_v5, %v1064_v2  ;;  %v1087_v17 = vcombine.low %v1082_v16, %v1083_v11 }
 0x143   : > { %v1089_v21 = vmul.f32 %v1087_v17, %v2460_v20  ;;  %v1111_v25 = vpop.permute.xlu1 %1110  ;;  %v1101_v14 = vpop.permute.xlu0 %1100 }
 0x144   : > { %v1102_v42 = vsel %vm530_vm0, %v1099_v26, %v1101_v14  ;;  %v1103_v18 = vsel %vm530_vm0, %v1101_v14, %v1099_v26 }
 0x145   : > { %v2626_v13 = vadd.f32 %v1089_v21, %v1077_v58  ;;  %v1107_v24 = vcombine.low %v1103_v18, %v1102_v42 }
 0x147   : > { %v1124_v22 = vpop.permute.xlu1 %1123  ;;  %v1113_v47 = vpop.permute.xlu0 %1112  ;;  %v1109_v54 = vmul.f32 %v1107_v24, %v2358_v15 }
 0x148   : > { %v1114_v59 = vsel %vm543_vm1, %v1111_v25, %v1113_v47  ;;  %v1115_v60 = vsel %vm543_vm1, %v1113_v47, %v1111_v25 }
 0x149   : > { %v1119_v1 = vcombine.low %v1115_v60, %v1114_v59 }
 0x14b   : > { %v1121_v63 = vmul.f32 %v1119_v1, %v2360_v10  ;;  %v1137_v4 = vpop.permute.xlu1 %1136  ;;  %v1126_v56 = vpop.permute.xlu0 %1125 }
 0x14c   : > { %v1127_v28 = vsel %vm557_vm2, %v1124_v22, %v1126_v56  ;;  %v1128_v62 = vsel %vm557_vm2, %v1126_v56, %v1124_v22  ;;  %v1150_v22 = vmul.f32 %v2216_v46, %v2396_v7 }
 0x14d   : > { %v1122_v2 = vadd.f32 %v1121_v63, %v1109_v54  ;;  %v1132_v23 = vcombine.low %v1128_v62, %v1127_v28 }
 0x14f   : > { %v1134_v5 = vmul.f32 %v1132_v23, %v2356_v3  ;;  %v1153_v26 = vpop.permute.xlu1 %1152  ;;  %v1139_v6 = vpop.permute.xlu0 %1138 }
 0x150   : > { %v1140_v16 = vsel %vm571_vm3, %v1137_v4, %v1139_v6  ;;  %v1141_v11 = vsel %vm571_vm3, %v1139_v6, %v1137_v4 }
 0x151   : > { %v1135_v58 = vadd.f32 %v1134_v5, %v1122_v2  ;;  %v1145_v17 = vcombine.low %v1141_v11, %v1140_v16  ;;  %v544_v16 = vsel %vm543_vm1, %v2155_v30, %v2165_v33  ;;  %v545_v11 = vsel %vm543_vm1, %v2165_v33, %v2155_v30 }
 0x152   : > { %v558_v33 = vsel %vm557_vm2, %v2163_v32, %v2173_v35 }
 0x153   : > { %v1147_v21 = vmul.f32 %v1145_v17, %v2394_v29  ;;  %v1166_v25 = vpop.permute.xlu1 %1165  ;;  %v1155_v14 = vpop.permute.xlu0 %1154 }
 0x154   : > { %v1156_v42 = vsel %vm588_vm4, %v1153_v26, %v1155_v14  ;;  %v1157_v18 = vsel %vm588_vm4, %v1155_v14, %v1153_v26  ;;  %v532_v14 = vsel %vm530_vm0, %v2157_v31, %v2142_v27 }
 0x155   : > { %v1148_v24 = vadd.f32 %v1147_v21, %v1135_v58  ;;  %v1161_v47 = vcombine.low %v1156_v42, %v1157_v18  ;;  %v559_v18 = vsel %vm557_vm2, %v2173_v35, %v2163_v32 }
 0x156   : > { %v563_v35 = vcombine.low %v559_v18, %v558_v33  ;;  %v603_v18 = vsel %vm602_vm5, %v2187_v38, %v2197_v41 }
 0x157   : > { %v1151_v59 = vadd.f32 %v1150_v22, %v1148_v24  ;;  %v1163_v60 = vmul.f32 %v1161_v47, %v2404_v45  ;;  %v1179_v1 = vpop.permute.xlu1 %1178  ;;  %v1168_v54 = vpop.permute.xlu0 %1167  ;;  %v549_v47 = vcombine.low %v545_v11, %v544_v16  ;;  %v589_v16 = vsel %vm588_vm4, %v2179_v36, %v2189_v39 }
 0x158   : > { %v1169_v63 = vsel %vm602_vm5, %v1166_v25, %v1168_v54  ;;  %v1170_v4 = vsel %vm602_vm5, %v1168_v54, %v1166_v25  ;;  %v531_v25 = vsel %vm530_vm0, %v2142_v27, %v2157_v31  ;;  %v572_v27 = vsel %vm571_vm3, %v2171_v34, %v2181_v37 }
 0x159   : > { %v1164_v56 = vadd.f32 %v1163_v60, %v1151_v59  ;;  %v1174_v28 = vcombine.low %v1169_v63, %v1170_v4  ;;  %v573_v31 = vsel %vm571_vm3, %v2181_v37, %v2171_v34  ;;  %v536_v32 = vcombine.low %v532_v14, %v531_v25 }
 0x15a   : > { %v662_v54 = vsel %vm543_vm1, %v2226_v48, %v2236_v51  ;;  %v663_v63 = vsel %vm543_vm1, %v2236_v51, %v2226_v48  ;;  %v551_v34 = vmul.f32 %v549_v47, %v2360_v10  ;;  %v577_v37 = vcombine.low %v573_v31, %v572_v27 }
 0x15b   : > { %v1176_v62 = vmul.f32 %v1174_v28, %v2432_v0  ;;  %v1192_v2 = vpop.permute.xlu1 %1191  ;;  %v1181_v23 = vpop.permute.xlu0 %1180  ;;  %v651_v28 = vsel %vm530_vm0, %v2228_v49, %v2211_v44  ;;  %v675_v48 = vsel %vm557_vm2, %v2234_v50, %v2244_v53  ;;  %v676_v51 = vsel %vm557_vm2, %v2244_v53, %v2234_v50 }
 0x15c   : > { %v1182_v46 = vsel %vm616_vm6, %v1179_v1, %v1181_v23  ;;  %v1183_v5 = vsel %vm616_vm6, %v1181_v23, %v1179_v1  ;;  %v538_v23 = vmul.f32 %v536_v32, %v2358_v15  ;;  %v579_v53 = vmul.f32 %v577_v37, %v2394_v29 }
 0x15d   : > { %v1177_v26 = vadd.f32 %v1176_v62, %v1164_v56  ;;  %v1187_v6 = vcombine.low %v1182_v46, %v1183_v5  ;;  %v650_v56 = vsel %vm530_vm0, %v2211_v44, %v2228_v49  ;;  %v565_v46 = vmul.f32 %v563_v35, %v2356_v3 }
 0x15e   : > { %v667_v5 = vcombine.low %v663_v63, %v662_v54  ;;  %v688_v44 = vsel %vm571_vm3, %v2242_v52, %v2252_v55  ;;  %v689_v49 = vsel %vm571_vm3, %v2252_v55, %v2242_v52  ;;  %v552_v50 = vadd.f32 %v551_v34, %v538_v23 }
 0x15f   : > { %v1189_v58 = vmul.f32 %v1187_v6, %v2439_v19  ;;  %v2669_v17 = vpop.permute.xlu1 %1211  ;;  %v1194_v21 = vpop.permute.xlu0 %1193  ;;  %v680_v6 = vcombine.low %v676_v51, %v675_v48  ;;  %v590_v11 = vsel %vm588_vm4, %v2189_v39, %v2179_v36  ;;  %v693_v25 = vcombine.low %v689_v49, %v688_v44  ;;  %v3039_v48 = vld [vmem:[#allocation14_spill] sm:$0xff]  ;;  %v3040_v51 = vld [vmem:[#allocation12_spill] sm:$0xff] }
 0x160   : > { %v1195_v42 = vsel %vm630_vm7, %v1192_v2, %v1194_v21  ;;  %v1196_v30 = vsel %vm630_vm7, %v1194_v21, %v1192_v2  ;;  %v566_v52 = vadd.f32 %v565_v46, %v552_v50  ;;  %v669_v55 = vmul.f32 %v667_v5, %v2360_v10 }
 0x161   : > { %v1190_v24 = vadd.f32 %v1189_v58, %v1177_v26  ;;  %v1200_v22 = vcombine.low %v1195_v42, %v1196_v30  ;;  %v655_v26 = vcombine.low %v651_v28, %v650_v56  ;;  %v594_v42 = vcombine.low %v589_v16, %v590_v11  ;;  %v3037_v56 = vld [vmem:[#allocation9_spill] sm:$0xff]  ;;  %v3038_v28 = vld [vmem:[#allocation8_spill] sm:$0xff] }
 0x162   : > { %v580_v14 = vadd.f32 %v579_v53, %v566_v52  ;;  %v682_v33 = vmul.f32 %v680_v6, %v2356_v3  ;;  %v604_v36 = vsel %vm602_vm5, %v2197_v41, %v2187_v38  ;;  %v695_v31 = vmul.f32 %v693_v25, %v2394_v29  ;;  %v3036_v41 = vld [vmem:[#allocation11_spill] sm:$0xff]  ;;  %v3041_v53 = vld [vmem:[#allocation16_spill] sm:$0xff] }
 0x163   : > { %v1202_v59 = vmul.f32 %v1200_v22, %v2460_v20  ;;  %v2700_v60 = vpop.permute.xlu1 %1223  ;;  %v2702_v1 = vpop.permute.xlu0 %1213  ;;  %v657_v30 = vmul.f32 %v655_v26, %v2358_v15  ;;  %v1885_v22 = vld [vmem:[%s1999_s13] sm:$0xff]  ;;  %v618_v38 = vsel %vm616_vm6, %v2205_v43, %v2195_v40  ;;  %v704_v32 = vsel %vm588_vm4, %v3036_v41, %v2260_v57  ;;  %v3042_v26 = vld [vmem:[#allocation13_spill] sm:$0xff] }
 0x164   : > { %v582_v47 = vmul.f32 %v1885_v22, %v2396_v7  ;;  %v705_v35 = vsel %vm588_vm4, %v2260_v57, %v3036_v41  ;;  %v596_v63 = vmul.f32 %v594_v42, %v2404_v45  ;;  %v608_v34 = vcombine.low %v603_v18, %v604_v36 }
 0x165   : > { %v2712_v4 = vadd.f32 %v1202_v59, %v1190_v24  ;;  %v670_v27 = vadd.f32 %v669_v55, %v657_v30  ;;  %v617_v59 = vsel %vm616_vm6, %v2195_v40, %v2205_v43  ;;  %v631_v40 = vsel %vm630_vm7, %v3038_v28, %v3037_v56  ;;  %v1886_v55 = vld [vmem:[%s1999_s13 + $0x8] sm:$0xff] }
 0x166   : > { %v583_v54 = vadd.f32 %v582_v47, %v580_v14  ;;  %v632_v43 = vsel %vm630_vm7, %v3037_v56, %v3038_v28  ;;  %v717_v57 = vsel %vm602_vm5, %v3040_v51, %v3039_v48  ;;  %v718_v23 = vsel %vm602_vm5, %v3039_v48, %v3040_v51  ;;  %v3043_v30 = vld [vmem:[#allocation17_spill] sm:$0xff] }
 0x167   : > { %v2731_v62 = vpop.permute.xlu1 %1236  ;;  %v2733_v2 = vpop.permute.xlu0 %1225  ;;  %v683_v37 = vadd.f32 %v682_v33, %v670_v27  ;;  %v622_v44 = vcombine.low %v617_v59, %v618_v38  ;;  %v709_v50 = vcombine.low %v704_v32, %v705_v35  ;;  %v730_v6 = vsel %vm616_vm6, %v3042_v26, %v3041_v53  ;;  %v3044_v33 = vld [vmem:[#allocation15_spill] sm:$0xff] }
 0x168   : > { %v731_v16 = vsel %vm616_vm6, %v3041_v53, %v3042_v26  ;;  %v610_v11 = vmul.f32 %v608_v34, %v2432_v0  ;;  %v636_v52 = vcombine.low %v631_v40, %v632_v43  ;;  %v698_v25 = vmul.f32 %v1886_v55, %v2396_v7 }
 0x169   : > { %v696_v49 = vadd.f32 %v695_v31, %v683_v37  ;;  %v722_v14 = vcombine.low %v717_v57, %v718_v23  ;;  %v597_v42 = vadd.f32 %v596_v63, %v583_v54  ;;  %v743_v18 = vsel %vm630_vm7, %v3044_v33, %v3043_v30 }
 0x16a   : > { %v744_v36 = vsel %vm630_vm7, %v3043_v30, %v3044_v33  ;;  %v624_v27 = vmul.f32 %v622_v44, %v2439_v19  ;;  %v711_v59 = vmul.f32 %v709_v50, %v2404_v45  ;;  %v735_v38 = vcombine.low %v730_v6, %v731_v16 }
 0x16b   : > { %v2754_v58 = vpop.permute.xlu1 %1249  ;;  %v2756_v21 = vpop.permute.xlu0 %1238  ;;  %v699_v31 = vadd.f32 %v698_v25, %v696_v49  ;;  %v724_v41 = vmul.f32 %v722_v14, %v2432_v0  ;;  %v748_v32 = vcombine.low %v743_v18, %v744_v36  ;;  %v611_v35 = vadd.f32 %v610_v11, %v597_v42 }
 0x16c   : > { %v638_v54 = vmul.f32 %v636_v52, %v2460_v20  ;;  %v737_v56 = vmul.f32 %v735_v38, %v2439_v19  ;;  %v1215_v44 = vsel %vm530_vm0, %v2669_v17, %v2702_v1  ;;  %v1216_v49 = vsel %vm530_vm0, %v2702_v1, %v2669_v17 }
 0x16d   : > { %v712_v37 = vadd.f32 %v711_v59, %v699_v31  ;;  %v625_v28 = vadd.f32 %v624_v27, %v611_v35  ;;  %v750_v48 = vmul.f32 %v748_v32, %v2460_v20  ;;  %v1227_v26 = vsel %vm543_vm1, %v2700_v60, %v2733_v2 }
 0x16e   : > { %v1228_v6 = vsel %vm543_vm1, %v2733_v2, %v2700_v60  ;;  %v1240_v16 = vsel %vm557_vm2, %v2731_v62, %v2756_v21  ;;  %v1241_v17 = vsel %vm557_vm2, %v2756_v21, %v2731_v62  ;;  %v2875_v11 = vcombine.high %v2475_v61, %v2475_v61  ;;  %v3045_v2 = vld [vmem:[#allocation4_spill] sm:$0xff] }
 0x16f   : > { %v2769_v39 = vpop.permute.xlu1 %1265  ;;  %v2771_v24 = vpop.permute.xlu0 %1251  ;;  %v639_v40 = vadd.f32 %v638_v54, %v625_v28  ;;  %v725_v43 = vadd.f32 %v724_v41, %v712_v37  ;;  %v1220_v30 = vcombine.low %v1216_v49, %v1215_v44  ;;  %v1232_v33 = vcombine.low %v1228_v6, %v1227_v26  ;;  %v3046_v26 = vld [vmem:[#allocation5_spill] sm:$0xff] }
 0x170   : > { %v1245_v18 = vcombine.low %v1241_v17, %v1240_v16  ;;  %v1253_v38 = vsel %vm571_vm3, %v2754_v58, %v2771_v24 }
 0x171   : > { %v738_v23 = vadd.f32 %v737_v56, %v725_v43  ;;  %v1328_v50 = vcombine.high %v639_v40, %v639_v40 }
 0x173   : > { %v2809_v46 = vpop.permute.xlu1 %1278  ;;  %v2811_v5 = vpop.permute.xlu0 %1267  ;;  %v751_v53 = vadd.f32 %v750_v48, %v738_v23  ;;  %v1222_v48 = vmul.f32 %v1220_v30, %v2358_v15 }
 0x174   : > { %v1270_v15 = vsel %vm588_vm4, %v2811_v5, %v2769_v39 }
 0x175   : > { %v1382_v36 = vcombine.high %v751_v53, %v751_v53 }
 0x177   : > { %v2832_v22 = vpop.permute.xlu1 %1291  ;;  %v2834_v47 = vpop.permute.xlu0 %1280 }
 0x17b   : > { %v2840_v63 = vpop.permute.xlu1 %1304  ;;  %v2842_v34 = vpop.permute.xlu0 %1293 }
 0x17f   : > { %v1325_v51 = vpop.permute.xlu1 %1324  ;;  %v2847_v57 = vpop.permute.xlu0 %1306 }
 0x180   : > { %v1330_v25 = vmul.f32 %v1325_v51, %v639_v40  ;;  %v1331_v14 = vmul.f32 %v1328_v50, %v1325_v51  ;;  %v1234_v40 = vmul.f32 %v1232_v33, %v2360_v10  ;;  %v1247_v51 = vmul.f32 %v1245_v18, %v2356_v3  ;;  %v1887_v50 = vld [vmem:[%s1999_s13 + $0x10] sm:$0xff] }
 0x181   : > { %v1269_v3 = vsel %vm588_vm4, %v2769_v39, %v2811_v5  ;;  %v1295_v39 = vsel %vm616_vm6, %v2832_v22, %v2842_v34  ;;  %v1296_v5 = vsel %vm616_vm6, %v2842_v34, %v2832_v22 }
 0x182   : > { %v1235_v16 = vadd.f32 %v1234_v40, %v1222_v48  ;;  %v1274_v30 = vcombine.low %v1269_v3, %v1270_v15 }
 0x183   : > { %v1348_v1 = vpop.permute.xlu1 %1347  ;;  %v1337_v52 = vpop.permute.xlu0 %1336 }
 0x184   : > { %v1339_v60 = vmul.f32 %v1886_v55, %v1337_v52  ;;  %v1340_v42 = vmul.f32 %v1337_v52, %v3045_v2  ;;  %v1353_v27 = vmul.f32 %v1348_v1, %v2475_v61  ;;  %v1354_v62 = vmul.f32 %v2875_v11, %v1348_v1 }
 0x185   : > { %v1254_v55 = vsel %vm571_vm3, %v2771_v24, %v2754_v58  ;;  %v1276_v34 = vmul.f32 %v1274_v30, %v2404_v45 }
 0x186   : > { %v1341_v21 = vadd.f32 %v1339_v60, %v1330_v25  ;;  %v1342_v31 = vadd.f32 %v1340_v42, %v1331_v14  ;;  %v1258_v43 = vcombine.low %v1254_v55, %v1253_v38  ;;  %v1248_v14 = vadd.f32 %v1247_v51, %v1235_v16 }
 0x187   : > { %v1379_v59 = vpop.permute.xlu1 %1378  ;;  %v1368_v35 = vpop.permute.xlu0 %1367  ;;  %v1283_v60 = vsel %vm602_vm5, %v2834_v47, %v2809_v46 }
 0x188   : > { %v1384_v41 = vmul.f32 %v1379_v59, %v751_v53  ;;  %v1385_v32 = vmul.f32 %v1382_v36, %v1379_v59  ;;  %v1355_v54 = vadd.f32 %v1353_v27, %v1341_v21  ;;  %v1356_v37 = vadd.f32 %v1354_v62, %v1342_v31  ;;  %v2930_v27 = vld [vmem:[%s1999_s13 + $0x30] sm:$0xff] }
 0x189   : > { %v1373_v56 = vmul.f32 %v1368_v35, %v2475_v61  ;;  %v1374_v28 = vmul.f32 %v1368_v35, %v2875_v11  ;;  %v1260_v10 = vmul.f32 %v1258_v43, %v2394_v29  ;;  %v1282_v29 = vsel %vm602_vm5, %v2809_v46, %v2834_v47 }
 0x18a   : > { %v1359_v58 = vcombine.low %v1355_v54, %v1356_v37  ;;  %v1287_v18 = vcombine.low %v1282_v29, %v1283_v60  ;;  %v1263_v46 = vmul.f32 %v2930_v27, %v2396_v7  ;;  %v1308_v47 = vsel %vm630_vm7, %v2840_v63, %v2847_v57 }
 0x18b   : > { %v2896_v24 = vpop.permute.xlu1 %1409  ;;  %v1392_v23 = vpop.permute.xlu0 %1391  ;;  %v1386_v44 = vadd.f32 %v1384_v41, %v1373_v56  ;;  %v1387_v49 = vadd.f32 %v1385_v32, %v1374_v28  ;;  %v1261_v42 = vadd.f32 %v1260_v10, %v1248_v14  ;;  %v1309_v62 = vsel %vm630_vm7, %v2847_v57, %v2840_v63  ;;  %v3047_v10 = vld [vmem:[#allocation6_spill] sm:$0xff] }
 0x18c   : > { %1361 = vst [vmem:[%s2893_s8] sm:$0xff] %v1359_v58  ;;  %v1394_v53 = vmul.f32 %v1887_v50, %v1392_v23  ;;  %v1395_v6 = vmul.f32 %v1392_v23, %v3046_v26  ;;  %v1421_v21 = vcombine.high %v2570_v9, %v2570_v9  ;;  %v1300_v31 = vcombine.low %v1295_v39, %v1296_v5  ;;  %v1891_v39 = vld [vmem:[%s1999_s13 + $0x28] sm:$0xff] }
 0x18d   : > { %v1264_v22 = vadd.f32 %v1263_v46, %v1261_v42  ;;  %v2947_v7 = vcombine.high %v2626_v13, %v2626_v13  ;;  %v1289_v38 = vmul.f32 %v1287_v18, %v2432_v0  ;;  %v1313_v55 = vcombine.low %v1308_v47, %v1309_v62  ;;  %v3049_v47 = vld [vmem:[#allocation7_spill] sm:$0xff] }
 0x18e   : > { %v1396_v17 = vadd.f32 %v1394_v53, %v1386_v44  ;;  %v1397_v1 = vadd.f32 %v1395_v6, %v1387_v49  ;;  %v1302_v45 = vmul.f32 %v1300_v31, %v2439_v19  ;;  %v1889_v44 = vld [vmem:[%s1999_s13 + $0x18] sm:$0xff]  ;;  %v1412_v6 = vmul.f32 %v1887_v50, %v2896_v24 }
 0x18f   : > { %v1452_v52 = vpop.permute.xlu1 %1451  ;;  %v1418_v25 = vpop.permute.xlu0 %1417  ;;  %v1277_v35 = vadd.f32 %v1276_v34, %v1264_v22  ;;  %v1315_v0 = vmul.f32 %v1313_v55, %v2460_v20  ;;  %v1413_v19 = vmul.f32 %v2896_v24, %v3046_v26  ;;  %v1547_v20 = vcombine.high %v2712_v4, %v2712_v4 }
 0x190   : > { %v1400_v2 = vcombine.low %v1396_v17, %v1397_v1  ;;  %v1423_v48 = vmul.f32 %v1418_v25, %v2570_v9  ;;  %v1424_v51 = vmul.f32 %v1421_v21, %v1418_v25  ;;  %v1457_v16 = vmul.f32 %v1452_v52, %v2475_v61 }
 0x191   : > { %v1290_v40 = vadd.f32 %v1289_v38, %v1277_v35  ;;  %v1458_v14 = vmul.f32 %v1452_v52, %v2875_v11 }
 0x192   : > { %1820 = vst [vmem:[%s2893_s8 + $0x8] sm:$0xff] %v1400_v2  ;;  %v1426_v3 = vadd.f32 %v1424_v51, %v1413_v19 }
 0x193   : > { %v1494_v33 = vpop.permute.xlu1 %1493  ;;  %v1463_v36 = vpop.permute.xlu0 %1462  ;;  %v1303_v43 = vadd.f32 %v1302_v45, %v1290_v40 }
 0x194   : > { %v1499_v32 = vmul.f32 %v1494_v33, %v2626_v13  ;;  %v1500_v12 = vmul.f32 %v1494_v33, %v2947_v7  ;;  %v1465_v49 = vmul.f32 %v1889_v44, %v1463_v36  ;;  %v1466_v17 = vmul.f32 %v1463_v36, %v3047_v10  ;;  %v1890_v33 = vld [vmem:[%s1999_s13 + $0x20] sm:$0xff]  ;;  %v3048_v36 = vld [vmem:[#allocation10_spill] sm:$0xff] }
 0x195   : > { %v1316_v53 = vadd.f32 %v1315_v0, %v1303_v43 }
 0x196   : > { %v1467_v24 = vadd.f32 %v1465_v49, %v1457_v16  ;;  %v1468_v30 = vadd.f32 %v1466_v17, %v1458_v14 }
 0x197   : > { %v1536_v59 = vpop.permute.xlu1 %1535  ;;  %v1505_v41 = vpop.permute.xlu0 %1504  ;;  %v1602_v26 = vcombine.high %v1316_v53, %v1316_v53 }
 0x198   : > { %v1510_v63 = vmul.f32 %v1505_v41, %v2570_v9  ;;  %v1511_v57 = vmul.f32 %v1505_v41, %v1421_v21  ;;  %v1425_v9 = vadd.f32 %v1423_v48, %v1412_v6  ;;  %v1538_v18 = vmul.f32 %v1890_v33, %v1536_v59 }
 0x199   : > { %v1539_v62 = vmul.f32 %v1536_v59, %v3049_v47 }
 0x19a   : > { %v1512_v54 = vadd.f32 %v1510_v63, %v1499_v32  ;;  %v1513_v37 = vadd.f32 %v1511_v57, %v1500_v12 }
 0x19b   : > { %v1578_v56 = vpop.permute.xlu1 %1577  ;;  %v1544_v28 = vpop.permute.xlu0 %1543 }
 0x19c   : > { %v1549_v29 = vmul.f32 %v1544_v28, %v2712_v4  ;;  %v1550_v60 = vmul.f32 %v1547_v20, %v1544_v28  ;;  %v1583_v34 = vmul.f32 %v1578_v56, %v2626_v13  ;;  %v1584_v31 = vmul.f32 %v1578_v56, %v2947_v7 }
 0x19e   : > { %v1551_v41 = vadd.f32 %v1549_v29, %v1538_v18  ;;  %v1552_v32 = vadd.f32 %v1550_v60, %v1539_v62 }
 0x19f   : > { %v2955_v58 = vpop.permute.xlu1 %1619  ;;  %v1589_v23 = vpop.permute.xlu0 %1588 }
 0x1a0   : > { %v1591_v5 = vmul.f32 %v1891_v39, %v1589_v23  ;;  %v1626_v19 = vmul.f32 %v2955_v58, %v1602_v26 }
 0x1a2   : > { %v1593_v59 = vadd.f32 %v1591_v5, %v1583_v34 }
 0x1a3   : > { %v1431_v1 = vpop.permute.xlu1 %1430  ;;  %v1631_v50 = vpop.permute.xlu0 %1630 }
 0x1a4   : > { %v1436_v15 = vmul.f32 %v1431_v1, %v2475_v61  ;;  %v1437_v25 = vmul.f32 %v1431_v1, %v2875_v11  ;;  %v1592_v61 = vmul.f32 %v1589_v23, %v3048_v36  ;;  %v1636_v40 = vmul.f32 %v1631_v50, %v2712_v4 }
 0x1a5   : > { %v1637_v51 = vmul.f32 %v1631_v50, %v1547_v20 }
 0x1a6   : > { %v1438_v2 = vadd.f32 %v1436_v15, %v1425_v9  ;;  %v1439_v42 = vadd.f32 %v1437_v25, %v1426_v3  ;;  %v1594_v57 = vadd.f32 %v1592_v61, %v1584_v31 }
 0x1a7   : > { %v1518_v46 = vpop.permute.xlu1 %1517  ;;  %v1473_v22 = vpop.permute.xlu0 %1472  ;;  %v1639_v1 = vadd.f32 %v1637_v51, %v1626_v19 }
 0x1a8   : > { %v1442_v21 = vcombine.low %v1438_v2, %v1439_v42  ;;  %v1520_v11 = vmul.f32 %v1890_v33, %v1518_v46  ;;  %v1521_v52 = vmul.f32 %v1518_v46, %v3049_v47  ;;  %v1478_v38 = vmul.f32 %v1473_v22, %v2626_v13 }
 0x1a9   : > { %v1479_v55 = vmul.f32 %v2947_v7, %v1473_v22 }
 0x1aa   : > { %1823 = vst [vmem:[%s2893_s8 + $0x10] sm:$0xff] %v1442_v21  ;;  %v1522_v12 = vadd.f32 %v1520_v11, %v1512_v54  ;;  %v1523_v63 = vadd.f32 %v1521_v52, %v1513_v37  ;;  %v1480_v35 = vadd.f32 %v1478_v38, %v1467_v24  ;;  %v1625_v37 = vmul.f32 %v2955_v58, %v1316_v53 }
 0x1ab   : > { %v1481_v45 = vadd.f32 %v1479_v55, %v1468_v30  ;;  %v1599_v28 = vpop.permute.xlu1 %1598  ;;  %v1557_v48 = vpop.permute.xlu0 %1556 }
 0x1ac   : > { %v1526_v0 = vcombine.low %v1522_v12, %v1523_v63  ;;  %v1604_v56 = vmul.f32 %v1599_v28, %v1316_v53  ;;  %v1605_v43 = vmul.f32 %v1602_v26, %v1599_v28  ;;  %v1562_v44 = vmul.f32 %v1557_v48, %v2626_v13 }
 0x1ad   : > { %v1484_v23 = vcombine.low %v1480_v35, %v1481_v45  ;;  %v1563_v54 = vmul.f32 %v1557_v48, %v2947_v7  ;;  %v1638_v10 = vadd.f32 %v1636_v40, %v1625_v37 }
 0x1ae   : > { %1829 = vst [vmem:[%s2893_s8 + $0x20] sm:$0xff] %v1526_v0  ;;  %v1606_v49 = vadd.f32 %v1604_v56, %v1593_v59  ;;  %v1607_v6 = vadd.f32 %v1605_v43, %v1594_v57  ;;  %v1564_v4 = vadd.f32 %v1562_v44, %v1551_v41 }
 0x1af   : > { %1826 = vst [vmem:[%s2893_s8 + $0x18] sm:$0xff] %v1484_v23  ;;  %v1565_v16 = vadd.f32 %v1563_v54, %v1552_v32  ;;  %v1644_v20 = vpop.permute.xlu0 %1643 }
 0x1b0   : > { %v1610_v17 = vcombine.low %v1606_v49, %v1607_v6  ;;  %v1646_v7 = vmul.f32 %v2930_v27, %v1644_v20  ;;  %v1647_v9 = vmul.f32 %v1644_v20, %v2306_v8 }
 0x1b1   : > { %v1568_v13 = vcombine.low %v1564_v4, %v1565_v16 }
 0x1b2   : > { %1835 = vst [vmem:[%s2893_s8 + $0x30] sm:$0xff] %v1610_v17  ;;  %v1648_v53 = vadd.f32 %v1646_v7, %v1638_v10  ;;  %v1649_v3 = vadd.f32 %v1647_v9, %v1639_v1 }
 0x1b3   : > { %1832 = vst [vmem:[%s2893_s8 + $0x28] sm:$0xff] %v1568_v13 }
 0x1b4   : > { %v1652_v15 = vcombine.low %v1648_v53, %v1649_v3 }
 0x1b6   : > { %1838 = vst [vmem:[%s2893_s8 + $0x38] sm:$0xff] %v1652_v15 }
 0x1b7 PF: > { %s14_s17 = sadd.s32 1, %s1914_s17   ;;  %s3050_s15 = smov %s1910_s16 }
 0x1b8   : > { %p11_p6 = scmp.ge.s32.totalorder %s14_s17, 4   ;;  %s3051_s16 = smov %s3053_s18 }
 0x1ba   :  { %13 = sbr.rel (!%p11_p6) target bundleno = 2 (0x2), region = 117 }

</bundles_post_ra>
